<compile_context>
chip_gen: v7x
topology: tpu7x:2x2x1
jax: 0.10.0
libtpu: 0.0.40
codegen_flags: <defaults>
</compile_context>

<pallas_src>
import jax
import jax.numpy as jnp
from jax.experimental import pallas as pl
from jax.experimental.pallas import tpu as pltpu

LANE = 128  # TPU lane width


def _round_up(x, m):
    return (x + m - 1) // m * m


def conv_bn_act_kernel(x_ref, w_ref, scale_ref, bias_ref, o_ref,
                       xpad_ref, patch_ref):
    """Grid = (batch n, Cout tile j).

    x_ref:     (1, H, W, Cin)           unpadded NHWC input for batch n
    w_ref:     (K*K*Cin_pad, TCout)     im2col-flattened, zero-padded weight tile
    scale_ref: (1, TCout)               folded BN scale  = gamma / sqrt(var + eps)
    bias_ref:  (1, TCout)               folded BN bias   = beta  - mean * scale
    o_ref:     (1, H, W, TCout)         lane-dense output tile
    xpad_ref:  (H+K-1, W+K-1, Cin_pad)  VMEM scratch: zero-padded ('same' halo) input
    patch_ref: (H*W, K*K*Cin_pad)       VMEM scratch: im2col patch (built once per n)
    """
    j = pl.program_id(1)
    _, H, W, _ = o_ref.shape
    Cin = x_ref.shape[3]
    Hp, _, Cin_pad = xpad_ref.shape
    K = Hp - H + 1
    pad = (K - 1) // 2

    # Build the zero-padded input and the im2col patch once per batch element
    # (Cout-tile index j == 0) and reuse it for every Cout tile of this batch element.
    @pl.when(j == 0)
    def _build_patch():
        xpad_ref[...] = jnp.zeros_like(xpad_ref)                  # halo + channel padding
        xpad_ref[pad:pad + H, pad:pad + W, :Cin] = x_ref[0]
        for kh in range(K):
            for kw in range(K):
                c0 = (kh * K + kw) * Cin_pad
                # Full-width, 128-lane-aligned store of each tap slab.
                patch_ref[:, c0:c0 + Cin_pad] = (
                    xpad_ref[kh:kh + H, kw:kw + W, :].reshape(H * W, Cin_pad))

    # Single MXU matmul: contraction = K*K*Cin_pad, f32 accumulation.
    acc = jnp.dot(patch_ref[...], w_ref[...],
                  preferred_element_type=jnp.float32)             # (H*W, TCout) f32

    # Folded BatchNorm (inference) + SiLU epilogue (f32). Reciprocal runs on the EUP.
    y = acc * scale_ref[...] + bias_ref[...]
    y = y * pl.reciprocal(1.0 + jnp.exp(-y), approx=False)        # SiLU = y * sigmoid(y)
    o_ref[0] = y.reshape(H, W, -1).astype(o_ref.dtype)


def conv_bn_act2d(x_nchw, weight_hwio, gamma, beta, running_mean, running_var,
                  eps=1e-5, compute_dtype=jnp.float32):
    """Forward pass matching ConvBnAct2d (conv3x3 same / eval-mode BatchNorm / SiLU).

    x_nchw:      (N, Cin, H, W)   PyTorch layout (transposed to NHWC once, internally)
    weight_hwio: (K, K, Cin, Cout)
    compute_dtype: jnp.float32 (default) or jnp.bfloat16 (recommended on v6e/v7x MXU).
    """
    N, Cin, H, W = x_nchw.shape
    K = weight_hwio.shape[0]
    Cout = weight_hwio.shape[-1]
    pad = (K - 1) // 2
    Hp, Wp = H + 2 * pad, W + 2 * pad

    # Lane-dense padded channel dims (padding lives in VMEM / weight only, not activations).
    Cin_pad = _round_up(Cin, LANE)
    Cout_p = _round_up(Cout, LANE)
    TCout = LANE                      # one 128-lane Cout slab per grid step
    n_ct = Cout_p // TCout
    KKCp = K * K * Cin_pad

    # NHWC activations; single boundary transpose for the NCHW interface.
    x = jnp.transpose(x_nchw, (0, 2, 3, 1)).astype(compute_dtype)

    # im2col-flattened weight, zero-padded: row index = (kh*K + kw)*Cin_pad + cin.
    w_p = (jnp.zeros((K * K, Cin_pad, Cout_p), compute_dtype)
           .at[:, :Cin, :Cout].set(weight_hwio.reshape(K * K, Cin, Cout)
                                   .astype(compute_dtype))
           .reshape(KKCp, Cout_p))

    # Folded eval-mode BatchNorm, zero-padded to Cout_p (kept in f32 for the epilogue).
    # TODO(synk): training-mode BatchNorm (batch statistics + running-stat update) not
    # implemented; eval-mode running-stat semantics are folded into scale/bias.
    inv_std = 1.0 / jnp.sqrt(running_var.astype(jnp.float32) + eps)
    scale = (gamma.astype(jnp.float32) * inv_std)
    bias = beta.astype(jnp.float32) - running_mean.astype(jnp.float32) * scale
    scale_p = jnp.zeros((1, Cout_p), jnp.float32).at[0, :Cout].set(scale)
    bias_p = jnp.zeros((1, Cout_p), jnp.float32).at[0, :Cout].set(bias)

    # TODO(synk): for activations too large for VMEM (e.g. v7x 64 MiB), add an H row-tile
    # grid axis with a K-1 row halo (manual DMA of the halo rows); not needed at these sizes.
    out_p = pl.pallas_call(
        conv_bn_act_kernel,
        out_shape=jax.ShapeDtypeStruct((N, H, W, Cout_p), jnp.float32),
        grid_spec=pltpu.PrefetchScalarGridSpec(
            num_scalar_prefetch=0,
            grid=(N, n_ct),
            in_specs=[
                pl.BlockSpec((1, H, W, Cin), lambda n, j: (n, 0, 0, 0)),
                pl.BlockSpec((KKCp, TCout), lambda n, j: (0, j)),
                pl.BlockSpec((1, TCout), lambda n, j: (0, j)),
                pl.BlockSpec((1, TCout), lambda n, j: (0, j)),
            ],
            out_specs=pl.BlockSpec((1, H, W, TCout), lambda n, j: (n, 0, 0, j)),
            scratch_shapes=[
                pltpu.VMEM((Hp, Wp, Cin_pad), compute_dtype),   # padded input halo
                pltpu.VMEM((H * W, KKCp), compute_dtype),       # im2col patch
            ],
        ),
        compiler_params=pltpu.CompilerParams(
            dimension_semantics=("parallel", "arbitrary")),
    )(x, w_p, scale_p, bias_p)

    out_nhwc = out_p[..., :Cout]                     # drop lane padding
    return jnp.transpose(out_nhwc, (0, 3, 1, 2)).astype(x_nchw.dtype)


def _reference(x_nchw, weight_hwio, gamma, beta, mean, var, eps=1e-5):
    x = jnp.transpose(x_nchw, (0, 2, 3, 1))
    y = jax.lax.conv_general_dilated(
        x, weight_hwio, window_strides=(1, 1), padding="SAME",
        dimension_numbers=("NHWC", "HWIO", "NHWC"))
    y = (y - mean) / jnp.sqrt(var + eps) * gamma + beta
    y = y * jax.nn.sigmoid(y)
    return jnp.transpose(y, (0, 3, 1, 2))


if __name__ == "__main__":
    key = jax.random.PRNGKey(0)
    kx, kw, kg, kb, km, kv = jax.random.split(key, 6)

    N, Cin, Cout, H, W, K = 2, 4, 8, 16, 16, 3
    x = jax.random.normal(kx, (N, Cin, H, W), jnp.float32)
    weight = jax.random.normal(kw, (K, K, Cin, Cout), jnp.float32) * 0.1
    gamma = 1.0 + 0.1 * jax.random.normal(kg, (Cout,), jnp.float32)
    beta = 0.1 * jax.random.normal(kb, (Cout,), jnp.float32)
    running_mean = 0.1 * jax.random.normal(km, (Cout,), jnp.float32)
    running_var = 1.0 + 0.1 * jax.random.uniform(kv, (Cout,), jnp.float32)

    out = conv_bn_act2d(x, weight, gamma, beta, running_mean, running_var)
    out = jax.block_until_ready(out)

    ref = _reference(x, weight, gamma, beta, running_mean, running_var)
    assert out.shape == (N, Cout, H, W)
    assert jnp.allclose(out, ref, atol=1e-4, rtol=1e-4)
    print("KERNEL_OK")
</pallas_src>

<mosaic_0001>
module attributes {stable_mosaic.version = 11 : i64} {
  func.func @conv_bn_act_kernel(%arg0: i32, %arg1: i32, %arg2: memref<1x16x16x4xf32, #tpu.memory_space<vmem>>, %arg3: memref<1152x128xf32, #tpu.memory_space<vmem>>, %arg4: memref<1x128xf32, #tpu.memory_space<vmem>>, %arg5: memref<1x128xf32, #tpu.memory_space<vmem>>, %arg6: memref<1x16x16x128xf32, #tpu.memory_space<vmem>>, %arg7: memref<18x18x128xf32, #tpu.memory_space<vmem>>, %arg8: memref<256x1152xf32, #tpu.memory_space<vmem>>) attributes {dimension_semantics = [#tpu.dimension_semantics<parallel>, #tpu.dimension_semantics<arbitrary>], iteration_bounds = array<i64: 2, 1>, scalar_prefetch = 0 : i64, scratch_operands = 2 : i64, tpu.core_type = #tpu.core_type<tc>, window_params = [{transform_indices = @transform_0, window_bounds = array<i64: 1, 16, 16, 4>}, {transform_indices = @transform_1, window_bounds = array<i64: 1152, 128>}, {transform_indices = @transform_2, window_bounds = array<i64: 1, 128>}, {transform_indices = @transform_3, window_bounds = array<i64: 1, 128>}, {transform_indices = @transform_4, window_bounds = array<i64: 1, 16, 16, 128>}]} {
    %c0_i32 = arith.constant 0 : i32
    %0 = arith.cmpi eq, %arg1, %c0_i32 : i32
    %1 = arith.extui %0 : i1 to i32
    %c0_i32_0 = arith.constant 0 : i32
    %2 = arith.cmpi ne, %1, %c0_i32_0 : i32
    scf.if %2 {
      %cst_14 = arith.constant 0.000000e+00 : f32
      %23 = vector.broadcast %cst_14 : f32 to vector<18x18x128xf32>
      %c0_15 = arith.constant 0 : index
      %c0_16 = arith.constant 0 : index
      %c0_17 = arith.constant 0 : index
      %24 = vector.load %arg7[%c0_15, %c0_16, %c0_17] : memref<18x18x128xf32, #tpu.memory_space<vmem>>, vector<18x18x128xf32>
      tpu.vector_store %arg7[%c0_15, %c0_16, %c0_17], %23 {strides = array<i32>} : memref<18x18x128xf32, #tpu.memory_space<vmem>>, vector<18x18x128xf32>,
      %c0_18 = arith.constant 0 : index
      %c0_19 = arith.constant 0 : index
      %c0_20 = arith.constant 0 : index
      %c0_21 = arith.constant 0 : index
      %25 = vector.load %arg2[%c0_18, %c0_19, %c0_20, %c0_21] : memref<1x16x16x4xf32, #tpu.memory_space<vmem>>, vector<1x16x16x4xf32>
      %26 = vector.shape_cast %25 : vector<1x16x16x4xf32> to vector<16x16x4xf32>
      %c1 = arith.constant 1 : index
      %c1_22 = arith.constant 1 : index
      %c0_23 = arith.constant 0 : index
      %27 = vector.load %arg7[%c1, %c1_22, %c0_23] : memref<18x18x128xf32, #tpu.memory_space<vmem>>, vector<16x16x4xf32>
      tpu.vector_store %arg7[%c1, %c1_22, %c0_23], %26 {strides = array<i32>} : memref<18x18x128xf32, #tpu.memory_space<vmem>>, vector<16x16x4xf32>,
      %c0_24 = arith.constant 0 : index
      %c0_25 = arith.constant 0 : index
      %c0_26 = arith.constant 0 : index
      %28 = vector.load %arg7[%c0_24, %c0_25, %c0_26] : memref<18x18x128xf32, #tpu.memory_space<vmem>>, vector<16x16x128xf32>
      %29 = vector.shape_cast %28 : vector<16x16x128xf32> to vector<256x128xf32>
      %c0_27 = arith.constant 0 : index
      %c0_28 = arith.constant 0 : index
      %30 = vector.load %arg8[%c0_27, %c0_28] : memref<256x1152xf32, #tpu.memory_space<vmem>>, vector<256x128xf32>
      tpu.vector_store %arg8[%c0_27, %c0_28], %29 {strides = array<i32>} : memref<256x1152xf32, #tpu.memory_space<vmem>>, vector<256x128xf32>,
      %c0_29 = arith.constant 0 : index
      %c1_30 = arith.constant 1 : index
      %c0_31 = arith.constant 0 : index
      %31 = vector.load %arg7[%c0_29, %c1_30, %c0_31] : memref<18x18x128xf32, #tpu.memory_space<vmem>>, vector<16x16x128xf32>
      %32 = vector.shape_cast %31 : vector<16x16x128xf32> to vector<256x128xf32>
      %c0_32 = arith.constant 0 : index
      %c128 = arith.constant 128 : index
      %33 = vector.load %arg8[%c0_32, %c128] : memref<256x1152xf32, #tpu.memory_space<vmem>>, vector<256x128xf32>
      tpu.vector_store %arg8[%c0_32, %c128], %32 {strides = array<i32>} : memref<256x1152xf32, #tpu.memory_space<vmem>>, vector<256x128xf32>,
      %c0_33 = arith.constant 0 : index
      %c2 = arith.constant 2 : index
      %c0_34 = arith.constant 0 : index
      %34 = vector.load %arg7[%c0_33, %c2, %c0_34] : memref<18x18x128xf32, #tpu.memory_space<vmem>>, vector<16x16x128xf32>
      %35 = vector.shape_cast %34 : vector<16x16x128xf32> to vector<256x128xf32>
      %c0_35 = arith.constant 0 : index
      %c256 = arith.constant 256 : index
      %36 = vector.load %arg8[%c0_35, %c256] : memref<256x1152xf32, #tpu.memory_space<vmem>>, vector<256x128xf32>
      tpu.vector_store %arg8[%c0_35, %c256], %35 {strides = array<i32>} : memref<256x1152xf32, #tpu.memory_space<vmem>>, vector<256x128xf32>,
      %c1_36 = arith.constant 1 : index
      %c0_37 = arith.constant 0 : index
      %c0_38 = arith.constant 0 : index
      %37 = vector.load %arg7[%c1_36, %c0_37, %c0_38] : memref<18x18x128xf32, #tpu.memory_space<vmem>>, vector<16x16x128xf32>
      %38 = vector.shape_cast %37 : vector<16x16x128xf32> to vector<256x128xf32>
      %c0_39 = arith.constant 0 : index
      %c384 = arith.constant 384 : index
      %39 = vector.load %arg8[%c0_39, %c384] : memref<256x1152xf32, #tpu.memory_space<vmem>>, vector<256x128xf32>
      tpu.vector_store %arg8[%c0_39, %c384], %38 {strides = array<i32>} : memref<256x1152xf32, #tpu.memory_space<vmem>>, vector<256x128xf32>,
      %c1_40 = arith.constant 1 : index
      %c1_41 = arith.constant 1 : index
      %c0_42 = arith.constant 0 : index
      %40 = vector.load %arg7[%c1_40, %c1_41, %c0_42] : memref<18x18x128xf32, #tpu.memory_space<vmem>>, vector<16x16x128xf32>
      %41 = vector.shape_cast %40 : vector<16x16x128xf32> to vector<256x128xf32>
      %c0_43 = arith.constant 0 : index
      %c512 = arith.constant 512 : index
      %42 = vector.load %arg8[%c0_43, %c512] : memref<256x1152xf32, #tpu.memory_space<vmem>>, vector<256x128xf32>
      tpu.vector_store %arg8[%c0_43, %c512], %41 {strides = array<i32>} : memref<256x1152xf32, #tpu.memory_space<vmem>>, vector<256x128xf32>,
      %c1_44 = arith.constant 1 : index
      %c2_45 = arith.constant 2 : index
      %c0_46 = arith.constant 0 : index
      %43 = vector.load %arg7[%c1_44, %c2_45, %c0_46] : memref<18x18x128xf32, #tpu.memory_space<vmem>>, vector<16x16x128xf32>
      %44 = vector.shape_cast %43 : vector<16x16x128xf32> to vector<256x128xf32>
      %c0_47 = arith.constant 0 : index
      %c640 = arith.constant 640 : index
      %45 = vector.load %arg8[%c0_47, %c640] : memref<256x1152xf32, #tpu.memory_space<vmem>>, vector<256x128xf32>
      tpu.vector_store %arg8[%c0_47, %c640], %44 {strides = array<i32>} : memref<256x1152xf32, #tpu.memory_space<vmem>>, vector<256x128xf32>,
      %c2_48 = arith.constant 2 : index
      %c0_49 = arith.constant 0 : index
      %c0_50 = arith.constant 0 : index
      %46 = vector.load %arg7[%c2_48, %c0_49, %c0_50] : memref<18x18x128xf32, #tpu.memory_space<vmem>>, vector<16x16x128xf32>
      %47 = vector.shape_cast %46 : vector<16x16x128xf32> to vector<256x128xf32>
      %c0_51 = arith.constant 0 : index
      %c768 = arith.constant 768 : index
      %48 = vector.load %arg8[%c0_51, %c768] : memref<256x1152xf32, #tpu.memory_space<vmem>>, vector<256x128xf32>
      tpu.vector_store %arg8[%c0_51, %c768], %47 {strides = array<i32>} : memref<256x1152xf32, #tpu.memory_space<vmem>>, vector<256x128xf32>,
      %c2_52 = arith.constant 2 : index
      %c1_53 = arith.constant 1 : index
      %c0_54 = arith.constant 0 : index
      %49 = vector.load %arg7[%c2_52, %c1_53, %c0_54] : memref<18x18x128xf32, #tpu.memory_space<vmem>>, vector<16x16x128xf32>
      %50 = vector.shape_cast %49 : vector<16x16x128xf32> to vector<256x128xf32>
      %c0_55 = arith.constant 0 : index
      %c896 = arith.constant 896 : index
      %51 = vector.load %arg8[%c0_55, %c896] : memref<256x1152xf32, #tpu.memory_space<vmem>>, vector<256x128xf32>
      tpu.vector_store %arg8[%c0_55, %c896], %50 {strides = array<i32>} : memref<256x1152xf32, #tpu.memory_space<vmem>>, vector<256x128xf32>,
      %c2_56 = arith.constant 2 : index
      %c2_57 = arith.constant 2 : index
      %c0_58 = arith.constant 0 : index
      %52 = vector.load %arg7[%c2_56, %c2_57, %c0_58] : memref<18x18x128xf32, #tpu.memory_space<vmem>>, vector<16x16x128xf32>
      %53 = vector.shape_cast %52 : vector<16x16x128xf32> to vector<256x128xf32>
      %c0_59 = arith.constant 0 : index
      %c1024 = arith.constant 1024 : index
      %54 = vector.load %arg8[%c0_59, %c1024] : memref<256x1152xf32, #tpu.memory_space<vmem>>, vector<256x128xf32>
      tpu.vector_store %arg8[%c0_59, %c1024], %53 {strides = array<i32>} : memref<256x1152xf32, #tpu.memory_space<vmem>>, vector<256x128xf32>,
    } else {
    }
    %c0 = arith.constant 0 : index
    %c0_1 = arith.constant 0 : index
    %3 = vector.load %arg8[%c0, %c0_1] : memref<256x1152xf32, #tpu.memory_space<vmem>>, vector<256x1152xf32>
    %c0_2 = arith.constant 0 : index
    %c0_3 = arith.constant 0 : index
    %4 = vector.load %arg3[%c0_2, %c0_3] : memref<1152x128xf32, #tpu.memory_space<vmem>>, vector<1152x128xf32>
    %cst = arith.constant dense<0.000000e+00> : vector<256x128xf32>
    %5 = tpu.matmul %3, %4, %cst {dimension_numbers = #tpu.dot_dimension_numbers<[1], [0], [0], [1], [0, 0, 1, 1], [], []>} : vector<256x1152xf32>, vector<1152x128xf32>, vector<256x128xf32> -> vector<256x128xf32>
    %c0_4 = arith.constant 0 : index
    %c0_5 = arith.constant 0 : index
    %6 = vector.load %arg4[%c0_4, %c0_5] : memref<1x128xf32, #tpu.memory_space<vmem>>, vector<1x128xf32>
    %7 = vector.broadcast %6 : vector<1x128xf32> to vector<256x128xf32>
    %8 = arith.mulf %5, %7 : vector<256x128xf32>
    %c0_6 = arith.constant 0 : index
    %c0_7 = arith.constant 0 : index
    %9 = vector.load %arg5[%c0_6, %c0_7] : memref<1x128xf32, #tpu.memory_space<vmem>>, vector<1x128xf32>
    %10 = vector.broadcast %9 : vector<1x128xf32> to vector<256x128xf32>
    %11 = arith.addf %8, %10 : vector<256x128xf32>
    %cst_8 = arith.constant 0.000000e+00 : f32
    %12 = vector.broadcast %cst_8 : f32 to vector<256x128xf32>
    %13 = arith.subf %12, %11 : vector<256x128xf32>
    %14 = math.exp %13 : vector<256x128xf32>
    %cst_9 = arith.constant 1.000000e+00 : f32
    %15 = vector.broadcast %cst_9 : f32 to vector<256x128xf32>
    %16 = arith.addf %15, %14 : vector<256x128xf32>
    %17 = tpu.reciprocal %16 : vector<256x128xf32> -> vector<256x128xf32>
    %18 = arith.mulf %11, %17 : vector<256x128xf32>
    %19 = vector.shape_cast %18 : vector<256x128xf32> to vector<16x16x128xf32>
    %c0_10 = arith.constant 0 : index
    %c0_11 = arith.constant 0 : index
    %c0_12 = arith.constant 0 : index
    %c0_13 = arith.constant 0 : index
    %20 = vector.load %arg6[%c0_10, %c0_11, %c0_12, %c0_13] : memref<1x16x16x128xf32, #tpu.memory_space<vmem>>, vector<1x16x16x128xf32>
    %21 = vector.shape_cast %20 : vector<1x16x16x128xf32> to vector<16x16x128xf32>
    %22 = vector.shape_cast %19 : vector<16x16x128xf32> to vector<1x16x16x128xf32>
    tpu.vector_store %arg6[%c0_10, %c0_11, %c0_12, %c0_13], %22 {strides = array<i32>} : memref<1x16x16x128xf32, #tpu.memory_space<vmem>>, vector<1x16x16x128xf32>,
    return
  }
  func.func @transform_0(%arg0: i32, %arg1: i32) -> (i32, i32, i32, i32) {
    %c0_i32 = arith.constant 0 : i32
    %c0_i32_0 = arith.constant 0 : i32
    %c0_i32_1 = arith.constant 0 : i32
    %c0_i32_2 = arith.constant 0 : i32
    return %arg0, %c0_i32, %c0_i32_0, %c0_i32_1 : i32, i32, i32, i32
  }
  func.func @transform_1(%arg0: i32, %arg1: i32) -> (i32, i32) {
    %c0_i32 = arith.constant 0 : i32
    %c0_i32_0 = arith.constant 0 : i32
    return %c0_i32, %arg1 : i32, i32
  }
  func.func @transform_2(%arg0: i32, %arg1: i32) -> (i32, i32) {
    %c0_i32 = arith.constant 0 : i32
    %c0_i32_0 = arith.constant 0 : i32
    return %c0_i32, %arg1 : i32, i32
  }
  func.func @transform_3(%arg0: i32, %arg1: i32) -> (i32, i32) {
    %c0_i32 = arith.constant 0 : i32
    %c0_i32_0 = arith.constant 0 : i32
    return %c0_i32, %arg1 : i32, i32
  }
  func.func @transform_4(%arg0: i32, %arg1: i32) -> (i32, i32, i32, i32) {
    %c0_i32 = arith.constant 0 : i32
    %c0_i32_0 = arith.constant 0 : i32
    %c0_i32_1 = arith.constant 0 : i32
    return %arg0, %c0_i32, %c0_i32_0, %arg1 : i32, i32, i32, i32
  }
}

</mosaic_0001>

<bundles_post_ra>
// kernel: tpu_custom_call.1
= control target key start
LH: loop header
LB: loop body
LE: loop exit
PB: predicated region body
PF: predicated region fallthrough
CT: control target
= control target key end

     0   :  { %9 = vsyncpa [#allocation5], 0  ;;  %s5150_s0 = inlined_call_operand.vmem [shape: f32[2,16,16,4], index: 0, kind: input, shape index: {}]   ;;  %s5151_s1 = inlined_call_operand.hbm [shape: f32[1152,128], index: 1, kind: input, shape index: {}]   ;;  %s5152_s2 = inlined_call_operand.vmem [shape: f32[1,128], index: 2, kind: input, shape index: {}]   ;;  %s5153_s3 = inlined_call_operand.vmem [shape: f32[1,128], index: 3, kind: input, shape index: {}]   ;;  %s5154_s4 = inlined_call_operand.hbm [shape: f32[2,16,16,128], index: 4, kind: output, shape index: {}]  }
   0x1   :  { %10 = vsyncpa [#allocation6], 0 }
   0x2   :  { %12 = vsyncpa [#allocation6 + $0x1], 0  ;;  %s3832_s15 = smov 0   ;;  %s3834_s16 = smov 0  }
   0x3   :  { %s3836_s17 = smov 0   ;;  %s3838_s18 = smov 0  }
   0x4   :  { %s3840_s19 = smov 0   ;;  %s3842_s20 = smov 0  }
   0x5 LB: > { %s2945_s21 = sadd.s32 4294967295, %s3797_s20   ;;  %s2946_s22 = sadd.s32 4294967294, %s3797_s20   ;;  %s3797_s20 = sphi %s3842_s20, %s18_s20   ;;  %s3793_s19 = sphi %s3840_s19, %s5315_s19   ;;  %s3789_s18 = sphi %s3838_s18, %s5314_s18   ;;  %s3785_s17 = sphi %s3836_s17, %s5313_s17   ;;  %s3781_s16 = sphi %s3834_s16, %s5312_s16   ;;  %s3777_s15 = sphi %s3832_s15, %s5311_s15  }
   0x6   : > { %s30_s23 = sadd.s32 1, %s3793_s19  ;;  %s143_s24 = sadd.s32 1, %s3785_s17 }
   0x7   : > { %p32_p0 = scmp.ge.s32.totalorder %s30_s23, 2  ;;  %p153_p1 = scmp.ne.s32.totalorder %s3785_s17, %s3781_s16 }
   0x8   : > { %p154_p2 = scmp.eq.s32.totalorder %s2945_s21, 1  ;;  %p159_p3 = scmp.ne.s32.totalorder %s3781_s16, %s3777_s15 }
   0x9   : > { %s5317_s23 = smov (%p32_p0, %s30_s23), 0  ;;  %p160_p5 = scmp.eq.s32.totalorder %s2946_s22, 1 }
   0xa   : > { %p3872_p4 = por %p154_p2, %p153_p1  ;;  %s138_s26 = ssub.s32 %s3793_s19, %s5317_s23 }
   0xb   : > { %p2947_p6 = scmp.ge.s32.totalorder %s3797_s20, 1  ;;  %p141_p7 = scmp.eq.s32.totalorder %s138_s26, 0 }
   0xc   : > { %s5219_s25 = scalar_select %p3872_p4, 1, 0 }
   0xd   : > { %p3879_p8 = por %p160_p5, %p159_p3  ;;  %p167_p9 = scmp.lt.s32.totalorder %s3797_s20, 3 }
   0xe   : > { %s3885_s28 = scalar_select %p141_p7, %s3785_s17, %s143_s24  }
   0xf   : > { %s5220_s27 = scalar_select %p3879_p8, 1, 0 }
  0x10   : > { %p3887_p10 = pnand %p2947_p6, %p167_p9  ;;  %p3891_p11 = scmp.eq.s32.totalorder %s2945_s21, 0 }
  0x11   : > { %s3799_s5 = smov [#allocation4]   ;;  %s3687_s10 = scalar_lea.hbm %s5151_s1, 18432 }
  0x12   : > { %s5221_s29 = scalar_select %p3887_p10, 1, 0 }
  0x13   : > { %s5222_s30 = scalar_select %p3891_p11, 1, 0 }
  0x14   : > { %p3492_p12 = pneg %p3887_p10  ;;  %s181_s6 = sshll.u32 %s3799_s5, 4  ;;  %s182_s6 = int_to_ptr.vmem [resolvable:$true] %s181_s6 }
  0x15   : > { %p3688_p0 = scmp.ne.s32.totalorder %s5151_s1, %s3687_s10  ;;  %p3694_p5 = scmp.lt.u32.totalorder %s3687_s10, %s5151_s1 }
  0x16   : > { %p3899_p13 = pnand %p3891_p11, %p3492_p12 }
  0x18   : > { %p3689_p1 = pneg %p3899_p13 }
  0x1a   : > { %p3690_p2 = pnand %p3689_p1, %p3688_p0 }
  0x1c   : > { %p3691_p3 = pneg %p3690_p2 }
  0x1e   : > { %p3696_p6 = pnand %p3694_p5, %p3691_p3 }
  0x20   : > { %3699 = shalt.err (!%p3696_p6)
}
  0x21   : > { %s3700_s21 = scalar_lea.vmem %s182_s6, 18432  ;;  %p3708_p8 = scmp.lt.s32.totalorder %s182_s6, %s182_s6 }
  0x22   : > { %p3701_p7 = scmp.ne.s32.totalorder %s182_s6, %s3700_s21  ;;  %p3709_p4 = scmp.lt.s32.totalorder %s3700_s21, %s3700_s21 }
  0x24   : > { %p3703_p9 = pnand %p3701_p7, %p3689_p1  ;;  %p3710_p11 = por %p3709_p4, %p3708_p8 }
  0x26   : > { %p3704_p12 = pneg %p3703_p9 }
  0x28   : > { %p3711_p10 = pnand %p3710_p11, %p3704_p12 }
  0x2a   : > { %3714 = shalt.err (!%p3711_p10)
}
  0x2b   : > { %s3800_s22 = smov 128   ;;  %s3801_s24 = smov 8  }
  0x2c   : > { %3495 = dma.hbm_to_vmem [thread:$0]  (!%p3899_p13), %s5151_s1, 18432, %s182_s6, [#allocation5], %s3800_s22, %s3800_s22, %s3801_s24  }
  0x2d   : > { %p5224_p0 = scmp.ne.s32.totalorder %s5221_s29, 0 }
  0x2f   : > { %217 = sbr.rel (%p5224_p0) target bundleno = 695 (0x2b7), region = 36 }
  0x36   : > { %p5225_p2 = scmp.ne.s32.totalorder %s5222_s30, 0 }
  0x38   : > { %3768 = dma.done.wait (%p5225_p2), [#allocation5], 18432  }
  0x39   : > { %3770 = vsyncadd (%p5225_p2), [#allocation5], 4294948864  ;;  %v5159_v0 = vmov 0.0|0.0   ;;  %v3803_v1 = vmov 0.0   ;;  %v1249_v2 = vld [vmem:[#allocation4] sm:$0xff]  ;;  %v1250_v3 = vld [vmem:[#allocation4 + $0x8] sm:$0xff] }
  0x3a   : > { %3094 = vmatprep.subr.bf16.mxu1 %v5159_v0  ;;  %3142 = vmatprep.subr.bf16.mxu0 %v5159_v0  ;;  %264 = vst [vmem:[#allocation2] sm:$0xff] %v3803_v1  ;;  %265 = vst [vmem:[#allocation2 + $0x8] sm:$0xff] %v3803_v1  ;;  %v1281_v4 = vld [vmem:[#allocation4 + $0x100] sm:$0xff]  ;;  %v3095_v5 = vpack.c.bf16 %v1250_v3, %v1249_v2  ;;  %v1282_v6 = vld [vmem:[#allocation4 + $0x108] sm:$0xff]  ;;  %p249_p4 = scmp.lt.s32.totalorder %s3789_s18, 1  ;;  %vm351_vm0 = vcmask 31744  }
  0x3b   : > { %266 = vst [vmem:[#allocation2 + $0x10] sm:$0x3] %v3803_v1  ;;  %267 = vst [vmem:[#allocation2 + $0x18] sm:$0xff] %v3803_v1  ;;  %v1251_v7 = vld [vmem:[#allocation4 + $0x10] sm:$0xff]  ;;  %v1252_v8 = vld [vmem:[#allocation4 + $0x18] sm:$0xff]  ;;  %v3143_v9 = vpack.c.bf16 %v1282_v6, %v1281_v4  ;;  %s246_s13 = sand.u32 1, %s3781_s16  }
  0x3c   : > { %268 = vst [vmem:[#allocation2 + $0x20] sm:$0xff] %v3803_v1  ;;  %269 = vst [vmem:[#allocation2 + $0x28] sm:$0x3] %v3803_v1  ;;  %v1283_v10 = vld [vmem:[#allocation4 + $0x110] sm:$0xff]  ;;  %v1284_v11 = vld [vmem:[#allocation4 + $0x118] sm:$0xff]  ;;  %3096 = vmatpush1.bf16.msra.mxu1 %v3095_v5  ;;  %v3098_v12 = vpack.c.bf16 %v1252_v8, %v1251_v7  ;;  %s250_s29 = scalar_select %p249_p4, %s3789_s18, 1 }
  0x3d   : > { %270 = vst [vmem:[#allocation2 + $0x30] sm:$0xff] %v3803_v1  ;;  %271 = vst [vmem:[#allocation2 + $0x38] sm:$0xff] %v3803_v1  ;;  %3144 = vmatpush1.bf16.msra.mxu0 %v3143_v9  ;;  %3097 = vmatprep.subr.bf16.mxu1 %v5159_v0  ;;  %v3146_v13 = vpack.c.bf16 %v1284_v11, %v1283_v10  ;;  %v1253_v14 = vld [vmem:[#allocation4 + $0x20] sm:$0xff]  ;;  %v1254_v15 = vld [vmem:[#allocation4 + $0x28] sm:$0xff]  ;;  %s4874_s14 = sshll.u32 %s246_s13, 8  ;;  %s2965_s22 = sshll.u32 %s3789_s18, 12 }
  0x3e   : > { %272 = vst [vmem:[#allocation2 + $0x40] sm:$0x3] %v3803_v1  ;;  %273 = vst [vmem:[#allocation2 + $0x48] sm:$0xff] %v3803_v1  ;;  %3145 = vmatprep.subr.bf16.mxu0 %v5159_v0  ;;  %v1285_v16 = vld [vmem:[#allocation4 + $0x120] sm:$0xff]  ;;  %v1286_v17 = vld [vmem:[#allocation4 + $0x128] sm:$0xff]  ;;  %v3101_v18 = vpack.c.bf16 %v1254_v15, %v1253_v14  ;;  %s2964_s30 = sshll.u32 %s250_s29, 8  ;;  %s5095_s29 = scalar_lea.hbm %s5154_s4, %s2965_s22 }
  0x3f   : > { %274 = vst [vmem:[#allocation2 + $0x50] sm:$0xff] %v3803_v1  ;;  %275 = vst [vmem:[#allocation2 + $0x58] sm:$0x3] %v3803_v1  ;;  %v3149_v19 = vpack.c.bf16 %v1286_v17, %v1285_v16  ;;  %v1255_v20 = vld [vmem:[#allocation4 + $0x30] sm:$0xff]  ;;  %v1256_v21 = vld [vmem:[#allocation4 + $0x38] sm:$0xff]  ;;  %s3994_s8 = scalar_lea.vmem %s5150_s0, %s2964_s30  ;;  %s4902_s21 = scalar_lea.vmem [#allocation7], %s4874_s14 }
  0x40   : > { %276 = vst [vmem:[#allocation2 + $0x60] sm:$0xff] %v3803_v1  ;;  %277 = vst [vmem:[#allocation2 + $0x68] sm:$0xff] %v3803_v1  ;;  %3099 = vmatpush1.bf16.msra.mxu1 %v3098_v12  ;;  %v1287_v22 = vld [vmem:[#allocation4 + $0x130] sm:$0xff]  ;;  %v1288_v23 = vld [vmem:[#allocation4 + $0x138] sm:$0xff]  ;;  %v3104_v24 = vpack.c.bf16 %v1256_v21, %v1255_v20  ;;  %s2835_s24 = sshll.u32 %s4902_s21, 4  ;;  %s5104_s18 = scalar_lea.sflag [#allocation6], %s246_s13  ;;  %s5097_s24 = int_to_ptr.vmem [resolvable:$true] %s2835_s24 }
  0x41   : > { %278 = vst [vmem:[#allocation2 + $0x70] sm:$0x3] %v3803_v1  ;;  %279 = vst [vmem:[#allocation2 + $0x78] sm:$0xff] %v3803_v1  ;;  %3147 = vmatpush1.bf16.msra.mxu0 %v3146_v13  ;;  %3100 = vmatprep.subr.bf16.mxu1 %v5159_v0  ;;  %v3152_v25 = vpack.c.bf16 %v1288_v23, %v1287_v22  ;;  %v1257_v26 = vld [vmem:[#allocation4 + $0x40] sm:$0xff]  ;;  %v1258_v27 = vld [vmem:[#allocation4 + $0x48] sm:$0xff]  ;;  %s3715_s30 = scalar_lea.vmem %s5097_s24, 4096 }
  0x42   : > { %280 = vst [vmem:[#allocation2 + $0x80] sm:$0xff] %v3803_v1  ;;  %281 = vst [vmem:[#allocation2 + $0x88] sm:$0x3] %v3803_v1  ;;  %3148 = vmatprep.subr.bf16.mxu0 %v5159_v0  ;;  %v1289_v28 = vld [vmem:[#allocation4 + $0x140] sm:$0xff]  ;;  %v1290_v29 = vld [vmem:[#allocation4 + $0x148] sm:$0xff]  ;;  %v3107_v30 = vpack.c.bf16 %v1258_v27, %v1257_v26  ;;  %p3716_p8 = scmp.ne.s32.totalorder %s5097_s24, %s3715_s30  ;;  %p5309_p10 = scmp.ne.s32.totalorder %s5219_s25, 0 }
  0x43   : > { %282 = vst [vmem:[#allocation2 + $0x90] sm:$0xff] %v3803_v1  ;;  %283 = vst [vmem:[#allocation2 + $0x98] sm:$0xff] %v3803_v1  ;;  %v3155_v31 = vpack.c.bf16 %v1290_v29, %v1289_v28  ;;  %v1259_v32 = vld [vmem:[#allocation4 + $0x50] sm:$0xff]  ;;  %v1260_v33 = vld [vmem:[#allocation4 + $0x58] sm:$0xff]  ;;  %s3804_s6 = smov [#allocation7]  }
  0x44   : > { %284 = vst [vmem:[#allocation2 + $0xa0] sm:$0x3] %v3803_v1  ;;  %285 = vst [vmem:[#allocation2 + $0xa8] sm:$0xff] %v3803_v1  ;;  %3102 = vmatpush1.bf16.msra.mxu1 %v3101_v18  ;;  %v1291_v34 = vld [vmem:[#allocation4 + $0x150] sm:$0xff]  ;;  %v1292_v35 = vld [vmem:[#allocation4 + $0x158] sm:$0xff]  ;;  %v3110_v36 = vpack.c.bf16 %v1260_v33, %v1259_v32  ;;  %p3717_p11 = pnand %p3716_p8, %p5309_p10  ;;  %s3719_s7 = sshll.u32 %s3804_s6, 4  ;;  %s3720_s7 = int_to_ptr.vmem [resolvable:$false] %s3719_s7 }
  0x45   : > { %286 = vst [vmem:[#allocation2 + $0xb0] sm:$0xff] %v3803_v1  ;;  %287 = vst [vmem:[#allocation2 + $0xb8] sm:$0x3] %v3803_v1  ;;  %3150 = vmatpush1.bf16.msra.mxu0 %v3149_v19  ;;  %3103 = vmatprep.subr.bf16.mxu1 %v5159_v0  ;;  %v3158_v37 = vpack.c.bf16 %v1292_v35, %v1291_v34  ;;  %v1261_v38 = vld [vmem:[#allocation4 + $0x60] sm:$0xff]  ;;  %v1262_v39 = vld [vmem:[#allocation4 + $0x68] sm:$0xff]  ;;  %p3722_p1 = scmp.lt.s32.totalorder %s5097_s24, %s3720_s7 }
  0x46   : > { %288 = vst [vmem:[#allocation2 + $0xc0] sm:$0xff] %v3803_v1  ;;  %289 = vst [vmem:[#allocation2 + $0xc8] sm:$0xff] %v3803_v1  ;;  %3151 = vmatprep.subr.bf16.mxu0 %v5159_v0  ;;  %v1293_v40 = vld [vmem:[#allocation4 + $0x160] sm:$0xff]  ;;  %v1294_v41 = vld [vmem:[#allocation4 + $0x168] sm:$0xff]  ;;  %v3113_v44 = vpack.c.bf16 %v1262_v39, %v1261_v38  ;;  %p3718_p13 = pneg %p3717_p11 }
  0x47   : > { %290 = vst [vmem:[#allocation2 + $0xd0] sm:$0x3] %v3803_v1  ;;  %291 = vst [vmem:[#allocation2 + $0xd8] sm:$0xff] %v3803_v1  ;;  %v448_v42 = vld [vmem:[#allocation2 + $0x1] sm:$0xff]  ;;  %v3161_v46 = vpack.c.bf16 %v1294_v41, %v1293_v40  ;;  %v320_v49 = vld [vmem:[%s3994_s8 + $0x10] sm:$0xff] }
  0x48   : > { %292 = vst [vmem:[#allocation2 + $0xe0] sm:$0xff] %v3803_v1  ;;  %293 = vst [vmem:[#allocation2 + $0xe8] sm:$0x3] %v3803_v1  ;;  %3105 = vmatpush1.bf16.msra.mxu1 %v3104_v24  ;;  %v318_v43 = vld [vmem:[%s3994_s8] sm:$0xff]  ;;  %1457 = vmatprep.mubr.f32.mxu1 %v448_v42  ;;  %v1264_v47 = vld [vmem:[#allocation4 + $0x78] sm:$0xff] }
  0x49   : > { %294 = vst [vmem:[#allocation2 + $0xf0] sm:$0xff] %v3803_v1  ;;  %295 = vst [vmem:[#allocation2 + $0xf8] sm:$0xff] %v3803_v1  ;;  %3153 = vmatpush1.bf16.msra.mxu0 %v3152_v25  ;;  %3106 = vmatprep.subr.bf16.mxu1 %v5159_v0  ;;  %v1263_v45 = vld [vmem:[#allocation4 + $0x70] sm:$0xff]  ;;  %v319_v48 = vld [vmem:[%s3994_s8 + $0x8] sm:$0xff] }
  0x4a   : > { %296 = vst [vmem:[#allocation2 + $0x100] sm:$0x3] %v3803_v1  ;;  %297 = vst [vmem:[#allocation2 + $0x108] sm:$0xff] %v3803_v1  ;;  %3154 = vmatprep.subr.bf16.mxu0 %v5159_v0  ;;  %v1295_v50 = vld [vmem:[#allocation4 + $0x170] sm:$0xff]  ;;  %v1296_v51 = vld [vmem:[#allocation4 + $0x178] sm:$0xff]  ;;  %v3116_v54 = vpack.c.bf16 %v1264_v47, %v1263_v45 }
  0x4b   : > { %298 = vst [vmem:[#allocation2 + $0x110] sm:$0xff] %v3803_v1  ;;  %299 = vst [vmem:[#allocation2 + $0x118] sm:$0x3] %v3803_v1  ;;  %v321_v52 = vld [vmem:[%s3994_s8 + $0x18] sm:$0xff]  ;;  %v322_v53 = vld [vmem:[%s3994_s8 + $0x20] sm:$0xff]  ;;  %v3164_v56 = vpack.c.bf16 %v1296_v51, %v1295_v50 }
  0x4c   : > { %300 = vst [vmem:[#allocation2 + $0x120] sm:$0xff] %v3803_v1  ;;  %301 = vst [vmem:[#allocation2 + $0x128] sm:$0xff] %v3803_v1  ;;  %3108 = vmatpush1.bf16.msra.mxu1 %v3107_v30  ;;  %v1265_v55 = vld [vmem:[#allocation4 + $0x80] sm:$0xff]  ;;  %v1266_v57 = vld [vmem:[#allocation4 + $0x88] sm:$0xff] }
  0x4d   : > { %302 = vst [vmem:[#allocation2 + $0x130] sm:$0x3] %v3803_v1  ;;  %303 = vst [vmem:[#allocation2 + $0x138] sm:$0xff] %v3803_v1  ;;  %3156 = vmatpush1.bf16.msra.mxu0 %v3155_v31  ;;  %3109 = vmatprep.subr.bf16.mxu1 %v5159_v0  ;;  %v323_v58 = vld [vmem:[%s3994_s8 + $0x28] sm:$0xff]  ;;  %v324_v59 = vld [vmem:[%s3994_s8 + $0x30] sm:$0xff]  ;;  %v3119_v63 = vpack.c.bf16 %v1266_v57, %v1265_v55 }
  0x4e   : > { %304 = vst [vmem:[#allocation2 + $0x140] sm:$0xff] %v3803_v1  ;;  %305 = vst [vmem:[#allocation2 + $0x148] sm:$0x3] %v3803_v1  ;;  %3157 = vmatprep.subr.bf16.mxu0 %v5159_v0  ;;  %v1297_v60 = vld [vmem:[#allocation4 + $0x180] sm:$0xff]  ;;  %v1298_v61 = vld [vmem:[#allocation4 + $0x188] sm:$0xff] }
  0x4f   : > { %306 = vst [vmem:[#allocation2 + $0x150] sm:$0xff] %v3803_v1  ;;  %307 = vst [vmem:[#allocation2 + $0x158] sm:$0xff] %v3803_v1  ;;  %v325_v2 = vld [vmem:[%s3994_s8 + $0x38] sm:$0xff]  ;;  %v326_v3 = vld [vmem:[%s3994_s8 + $0x40] sm:$0xff]  ;;  %v3167_v4 = vpack.c.bf16 %v1298_v61, %v1297_v60 }
  0x50   : > { %308 = vst [vmem:[#allocation2 + $0x160] sm:$0x3] %v3803_v1  ;;  %309 = vst [vmem:[#allocation2 + $0x168] sm:$0xff] %v3803_v1  ;;  %3111 = vmatpush1.bf16.msra.mxu1 %v3110_v36  ;;  %v1267_v5 = vld [vmem:[#allocation4 + $0x90] sm:$0xff]  ;;  %v1268_v6 = vld [vmem:[#allocation4 + $0x98] sm:$0xff] }
  0x51   : > { %310 = vst [vmem:[#allocation2 + $0x170] sm:$0xff] %v3803_v1  ;;  %311 = vst [vmem:[#allocation2 + $0x178] sm:$0x3] %v3803_v1  ;;  %3159 = vmatpush1.bf16.msra.mxu0 %v3158_v37  ;;  %3112 = vmatprep.subr.bf16.mxu1 %v5159_v0  ;;  %v1299_v7 = vld [vmem:[#allocation4 + $0x190] sm:$0xff]  ;;  %v1300_v8 = vld [vmem:[#allocation4 + $0x198] sm:$0xff]  ;;  %v3122_v9 = vpack.c.bf16 %v1268_v6, %v1267_v5 }
  0x52   : > { %312 = vst [vmem:[#allocation2 + $0x180] sm:$0xff] %v3803_v1  ;;  %313 = vst [vmem:[#allocation2 + $0x188] sm:$0xff] %v3803_v1  ;;  %3160 = vmatprep.subr.bf16.mxu0 %v5159_v0  ;;  %v3170_v10 = vpack.c.bf16 %v1300_v8, %v1299_v7  ;;  %v1269_v11 = vld [vmem:[#allocation4 + $0xa0] sm:$0xff]  ;;  %v1270_v12 = vld [vmem:[#allocation4 + $0xa8] sm:$0xff] }
  0x53   : > { %314 = vst [vmem:[#allocation2 + $0x190] sm:$0x3] %v3803_v1  ;;  %315 = vst [vmem:[#allocation2 + $0x198] sm:$0xff] %v3803_v1  ;;  %v1301_v13 = vld [vmem:[#allocation4 + $0x1a0] sm:$0xff]  ;;  %v1302_v14 = vld [vmem:[#allocation4 + $0x1a8] sm:$0xff]  ;;  %v3125_v15 = vpack.c.bf16 %v1270_v12, %v1269_v11 }
  0x54   : > { %316 = vst [vmem:[#allocation2 + $0x1a0] sm:$0xff] %v3803_v1  ;;  %317 = vst [vmem:[#allocation2 + $0x1a8] sm:$0x3] %v3803_v1  ;;  %3114 = vmatpush1.bf16.msra.mxu1 %v3113_v44  ;;  %v3173_v16 = vpack.c.bf16 %v1302_v14, %v1301_v13  ;;  %v1271_v17 = vld [vmem:[#allocation4 + $0xb0] sm:$0xff]  ;;  %v1272_v18 = vld [vmem:[#allocation4 + $0xb8] sm:$0xff] }
  0x55   : > { %352 = vst.msk [vmem:[#allocation2 + $0x19] sm:$0xff] %vm351_vm0, %v318_v43  ;;  %353 = vst.msk [vmem:[#allocation2 + $0x21] sm:$0xff] %vm351_vm0, %v319_v48  ;;  %3162 = vmatpush1.bf16.msra.mxu0 %v3161_v46  ;;  %3115 = vmatprep.subr.bf16.mxu1 %v5159_v0  ;;  %v327_v19 = vld [vmem:[%s3994_s8 + $0x48] sm:$0xff]  ;;  %v1303_v20 = vld [vmem:[#allocation4 + $0x1b0] sm:$0xff]  ;;  %v3128_v23 = vpack.c.bf16 %v1272_v18, %v1271_v17 }
  0x56   : > { %354 = vst.msk [vmem:[#allocation2 + $0x31] sm:$0xff] %vm351_vm0, %v320_v49  ;;  %355 = vst.msk [vmem:[#allocation2 + $0x39] sm:$0xff] %vm351_vm0, %v321_v52  ;;  %3163 = vmatprep.subr.bf16.mxu0 %v5159_v0  ;;  %v1304_v21 = vld [vmem:[#allocation4 + $0x1b8] sm:$0xff]  ;;  %v328_v22 = vld [vmem:[%s3994_s8 + $0x50] sm:$0xff] }
  0x57   : > { %356 = vst.msk [vmem:[#allocation2 + $0x49] sm:$0xff] %vm351_vm0, %v322_v53  ;;  %357 = vst.msk [vmem:[#allocation2 + $0x51] sm:$0xff] %vm351_vm0, %v323_v58  ;;  %v329_v24 = vld [vmem:[%s3994_s8 + $0x58] sm:$0xff]  ;;  %v330_v25 = vld [vmem:[%s3994_s8 + $0x60] sm:$0xff]  ;;  %v3176_v26 = vpack.c.bf16 %v1304_v21, %v1303_v20 }
  0x58   : > { %358 = vst.msk [vmem:[#allocation2 + $0x61] sm:$0xff] %vm351_vm0, %v324_v59  ;;  %3117 = vmatpush1.bf16.msra.mxu1 %v3116_v54  ;;  %359 = vst.msk [vmem:[#allocation2 + $0x69] sm:$0xff] %vm351_vm0, %v325_v2  ;;  %v1273_v27 = vld [vmem:[#allocation4 + $0xc0] sm:$0xff]  ;;  %v1274_v28 = vld [vmem:[#allocation4 + $0xc8] sm:$0xff] }
  0x59   : > { %3165 = vmatpush1.bf16.msra.mxu0 %v3164_v56  ;;  %3118 = vmatprep.subr.bf16.mxu1 %v5159_v0  ;;  %360 = vst.msk [vmem:[#allocation2 + $0x79] sm:$0xff] %vm351_vm0, %v326_v3  ;;  %361 = vst.msk [vmem:[#allocation2 + $0x81] sm:$0xff] %vm351_vm0, %v327_v19  ;;  %v1305_v29 = vld [vmem:[#allocation4 + $0x1c0] sm:$0xff]  ;;  %v1306_v30 = vld [vmem:[#allocation4 + $0x1c8] sm:$0xff]  ;;  %v3131_v33 = vpack.c.bf16 %v1274_v28, %v1273_v27 }
  0x5a   : > { %3166 = vmatprep.subr.bf16.mxu0 %v5159_v0  ;;  %362 = vst.msk [vmem:[#allocation2 + $0x91] sm:$0xff] %vm351_vm0, %v328_v22  ;;  %363 = vst.msk [vmem:[#allocation2 + $0x99] sm:$0xff] %vm351_vm0, %v329_v24  ;;  %v331_v31 = vld [vmem:[%s3994_s8 + $0x68] sm:$0xff]  ;;  %v332_v32 = vld [vmem:[%s3994_s8 + $0x70] sm:$0xff]  ;;  %v3179_v36 = vpack.c.bf16 %v1306_v30, %v1305_v29 }
  0x5b   : > { %364 = vst.msk [vmem:[#allocation2 + $0xa9] sm:$0xff] %vm351_vm0, %v330_v25  ;;  %365 = vst.msk [vmem:[#allocation2 + $0xb1] sm:$0xff] %vm351_vm0, %v331_v31  ;;  %v333_v34 = vld [vmem:[%s3994_s8 + $0x78] sm:$0xff]  ;;  %v334_v35 = vld [vmem:[%s3994_s8 + $0x80] sm:$0xff] }
  0x5c   : > { %v4014_v62 = vld [vmem:[#allocation2 + $0x18] sm:$0xff]  ;;  %3120 = vmatpush1.bf16.msra.mxu1 %v3119_v63  ;;  %366 = vst.msk [vmem:[#allocation2 + $0xc1] sm:$0xff] %vm351_vm0, %v332_v32  ;;  %v1275_v37 = vld [vmem:[#allocation4 + $0xd0] sm:$0xff]  ;;  %v1276_v38 = vld [vmem:[#allocation4 + $0xd8] sm:$0xff] }
  0x5d   : > { %1682 = vmatprep.mubr.f32.mxu0 %v4014_v62  ;;  %3168 = vmatpush1.bf16.msra.mxu0 %v3167_v4  ;;  %367 = vst.msk [vmem:[#allocation2 + $0xc9] sm:$0xff] %vm351_vm0, %v333_v34  ;;  %368 = vst.msk [vmem:[#allocation2 + $0xd9] sm:$0xff] %vm351_vm0, %v334_v35  ;;  %v1307_v39 = vld [vmem:[#allocation4 + $0x1d0] sm:$0xff]  ;;  %v1308_v40 = vld [vmem:[#allocation4 + $0x1d8] sm:$0xff]  ;;  %v3134_v41 = vpack.c.bf16 %v1276_v38, %v1275_v37 }
  0x5e   : > { %3121 = vmatprep.subr.bf16.mxu1 %v5159_v0  ;;  %3169 = vmatprep.subr.bf16.mxu0 %v5159_v0  ;;  %v3182_v42 = vpack.c.bf16 %v1308_v40, %v1307_v39  ;;  %v1277_v43 = vld [vmem:[#allocation4 + $0xe0] sm:$0xff]  ;;  %v1278_v44 = vld [vmem:[#allocation4 + $0xe8] sm:$0xff]  ;;  %v1279_v49 = vld [vmem:[#allocation4 + $0xf0] sm:$0xff] }
  0x5f   : > { %v1309_v45 = vld [vmem:[#allocation4 + $0x1e0] sm:$0xff]  ;;  %v1310_v46 = vld [vmem:[#allocation4 + $0x1e8] sm:$0xff]  ;;  %v3137_v47 = vpack.c.bf16 %v1278_v44, %v1277_v43  ;;  %v1280_v50 = vld [vmem:[#allocation4 + $0xf8] sm:$0xff] }
  0x60   : > { %3123 = vmatpush1.bf16.msra.mxu1 %v3122_v9  ;;  %v3185_v48 = vpack.c.bf16 %v1310_v46, %v1309_v45  ;;  %v335_v51 = vld [vmem:[%s3994_s8 + $0x88] sm:$0xff]  ;;  %v1311_v52 = vld [vmem:[#allocation4 + $0x1f0] sm:$0xff]  ;;  %v336_v54 = vld [vmem:[%s3994_s8 + $0x90] sm:$0xff]  ;;  %v3140_v55 = vpack.c.bf16 %v1280_v50, %v1279_v49 }
  0x61   : > { %3171 = vmatpush1.bf16.msra.mxu0 %v3170_v10  ;;  %3124 = vmatprep.subr.bf16.mxu1 %v5159_v0  ;;  %v1312_v53 = vld [vmem:[#allocation4 + $0x1f8] sm:$0xff]  ;;  %369 = vst.msk [vmem:[#allocation2 + $0xe1] sm:$0xff] %vm351_vm0, %v335_v51  ;;  %370 = vst.msk [vmem:[#allocation2 + $0xf1] sm:$0xff] %vm351_vm0, %v336_v54  ;;  %v337_v56 = vld [vmem:[%s3994_s8 + $0x98] sm:$0xff] }
  0x62   : > { %3172 = vmatprep.subr.bf16.mxu0 %v5159_v0  ;;  %v338_v57 = vld [vmem:[%s3994_s8 + $0xa0] sm:$0xff]  ;;  %v3188_v58 = vpack.c.bf16 %v1312_v53, %v1311_v52  ;;  %v1313_v59 = vld [vmem:[#allocation4 + $0x200] sm:$0xff]  ;;  %v1346_v61 = vld [vmem:[#allocation4 + $0x308] sm:$0xff]  ;;  %371 = vst.msk [vmem:[#allocation2 + $0xf9] sm:$0xff] %vm351_vm0, %v337_v56 }
  0x63   : > { %v1345_v60 = vld [vmem:[#allocation4 + $0x300] sm:$0xff]  ;;  %372 = vst.msk [vmem:[#allocation2 + $0x109] sm:$0xff] %vm351_vm0, %v338_v57  ;;  %v1314_v63 = vld [vmem:[#allocation4 + $0x208] sm:$0xff]  ;;  %v339_v2 = vld [vmem:[%s3994_s8 + $0xa8] sm:$0xff] }
  0x64   : > { %3126 = vmatpush1.bf16.msra.mxu1 %v3125_v15  ;;  %v340_v3 = vld [vmem:[%s3994_s8 + $0xb0] sm:$0xff]  ;;  %373 = vst.msk [vmem:[#allocation2 + $0x111] sm:$0xff] %vm351_vm0, %v339_v2  ;;  %v4067_v4 = vpack.c.bf16 %v1346_v61, %v1345_v60  ;;  %v341_v5 = vld [vmem:[%s3994_s8 + $0xb8] sm:$0xff]  ;;  %v342_v6 = vld [vmem:[%s3994_s8 + $0xc0] sm:$0xff]  ;;  %v3191_v8 = vpack.c.bf16 %v1314_v63, %v1313_v59 }
  0x65   : > { %3174 = vmatpush1.bf16.msra.mxu0 %v3173_v16  ;;  %3127 = vmatprep.subr.bf16.mxu1 %v5159_v0  ;;  %374 = vst.msk [vmem:[#allocation2 + $0x121] sm:$0xff] %vm351_vm0, %v340_v3  ;;  %v512_v7 = vld [vmem:[#allocation2 + $0x2] sm:$0xff]  ;;  %375 = vst.msk [vmem:[#allocation2 + $0x129] sm:$0xff] %vm351_vm0, %v341_v5  ;;  %v513_v15 = vld [vmem:[#allocation2 + $0xa] sm:$0xff] }
  0x66   : > { %3175 = vmatprep.subr.bf16.mxu0 %v5159_v0  ;;  %376 = vst.msk [vmem:[#allocation2 + $0x139] sm:$0xff] %vm351_vm0, %v342_v6  ;;  %v449_v9 = vld [vmem:[#allocation2 + $0x9] sm:$0xff]  ;;  %v1315_v10 = vld [vmem:[#allocation4 + $0x210] sm:$0xff]  ;;  %v1318_v21 = vld [vmem:[#allocation4 + $0x228] sm:$0xff] }
  0x67   : > { %v1316_v11 = vld [vmem:[#allocation4 + $0x218] sm:$0xff]  ;;  %v577_v12 = vld [vmem:[#allocation2 + $0x20] sm:$0xff]  ;;  %v4079_v18 = vld [vmem:[#allocation2 + $0x30] sm:$0xff] }
  0x68   : > { %3129 = vmatpush1.bf16.msra.mxu1 %v3128_v23  ;;  %v1347_v13 = vld [vmem:[#allocation4 + $0x310] sm:$0xff]  ;;  %v1348_v14 = vld [vmem:[#allocation4 + $0x318] sm:$0xff]  ;;  %v3194_v17 = vpack.c.bf16 %v1316_v11, %v1315_v10  ;;  %v1317_v20 = vld [vmem:[#allocation4 + $0x220] sm:$0xff] }
  0x69   : > { %3177 = vmatpush1.bf16.msra.mxu0 %v3176_v26  ;;  %3130 = vmatprep.subr.bf16.mxu1 %v5159_v0  ;;  %v4077_v16 = vld [vmem:[#allocation2 + $0x19] sm:$0xff]  ;;  %v4082_v19 = vpack.c.bf16 %v1348_v14, %v1347_v13  ;;  %v1349_v22 = vld [vmem:[#allocation4 + $0x320] sm:$0xff]  ;;  %v4090_v26 = vld [vmem:[#allocation2 + $0x21] sm:$0xff]  ;;  %v3197_v27 = vpack.c.bf16 %v1318_v21, %v1317_v20 }
  0x6a   : > { %3178 = vmatprep.subr.bf16.mxu0 %v5159_v0  ;;  %v1350_v23 = vld [vmem:[#allocation4 + $0x328] sm:$0xff]  ;;  %v1319_v24 = vld [vmem:[#allocation4 + $0x230] sm:$0xff]  ;;  %v343_v28 = vld [vmem:[%s3994_s8 + $0xc8] sm:$0xff] }
  0x6b   : > { %v4088_v25 = vld [vmem:[#allocation2 + $0x1a] sm:$0xff]  ;;  %v4097_v29 = vpack.c.bf16 %v1350_v23, %v1349_v22  ;;  %v1320_v30 = vld [vmem:[#allocation4 + $0x238] sm:$0xff]  ;;  %377 = vst.msk [vmem:[#allocation2 + $0x141] sm:$0xff] %vm351_vm0, %v343_v28  ;;  %v344_v31 = vld [vmem:[%s3994_s8 + $0xd0] sm:$0xff] }
  0x6c   : > { %3132 = vmatpush1.bf16.msra.mxu1 %v3131_v33  ;;  %v1351_v32 = vld [vmem:[#allocation4 + $0x330] sm:$0xff]  ;;  %v1352_v33 = vld [vmem:[#allocation4 + $0x338] sm:$0xff]  ;;  %378 = vst.msk [vmem:[#allocation2 + $0x151] sm:$0xff] %vm351_vm0, %v344_v31  ;;  %v1321_v34 = vld [vmem:[#allocation4 + $0x240] sm:$0xff]  ;;  %v3200_v39 = vpack.c.bf16 %v1320_v30, %v1319_v24 }
  0x6d   : > { %3180 = vmatpush1.bf16.msra.mxu0 %v3179_v36  ;;  %3133 = vmatprep.subr.bf16.mxu1 %v5159_v0  ;;  %v345_v35 = vld [vmem:[%s3994_s8 + $0xd8] sm:$0xff]  ;;  %v346_v36 = vld [vmem:[%s3994_s8 + $0xe0] sm:$0xff]  ;;  %v4113_v38 = vld [vmem:[#allocation2 + $0x48] sm:$0xff]  ;;  %v4119_v40 = vpack.c.bf16 %v1352_v33, %v1351_v32 }
  0x6e   : > { %3181 = vmatprep.subr.bf16.mxu0 %v5159_v0  ;;  %v4109_v37 = vld [vmem:[#allocation2 + $0x22] sm:$0xff]  ;;  %379 = vst.msk [vmem:[#allocation2 + $0x159] sm:$0xff] %vm351_vm0, %v345_v35  ;;  %380 = vst.msk [vmem:[#allocation2 + $0x169] sm:$0xff] %vm351_vm0, %v346_v36  ;;  %v348_v43 = vld [vmem:[%s3994_s8 + $0xf0] sm:$0xff] }
  0x6f   : > { %v1353_v44 = vld [vmem:[#allocation4 + $0x340] sm:$0xff]  ;;  %v1354_v45 = vld [vmem:[#allocation4 + $0x348] sm:$0xff]  ;;  %382 = vst.msk [vmem:[#allocation2 + $0x181] sm:$0xff] %vm351_vm0, %v348_v43  ;;  %v1323_v52 = vld [vmem:[#allocation4 + $0x250] sm:$0xff] }
  0x70   : > { %3135 = vmatpush1.bf16.msra.mxu1 %v3134_v41  ;;  %v1322_v41 = vld [vmem:[#allocation4 + $0x248] sm:$0xff]  ;;  %v581_v50 = vld [vmem:[#allocation2 + $0x50] sm:$0xff]  ;;  %v4137_v51 = vpack.c.bf16 %v1354_v45, %v1353_v44  ;;  %v1324_v53 = vld [vmem:[#allocation4 + $0x258] sm:$0xff] }
  0x71   : > { %3183 = vmatpush1.bf16.msra.mxu0 %v3182_v42  ;;  %3136 = vmatprep.subr.bf16.mxu1 %v5159_v0  ;;  %v347_v42 = vld [vmem:[%s3994_s8 + $0xe8] sm:$0xff]  ;;  %v349_v46 = vld [vmem:[%s3994_s8 + $0xf8] sm:$0xff]  ;;  %v3203_v49 = vpack.c.bf16 %v1322_v41, %v1321_v34  ;;  %v1355_v54 = vld [vmem:[#allocation4 + $0x350] sm:$0xff]  ;;  %s3721_s8 = scalar_lea.vmem %s3720_s7, 8192 }
  0x72   : > { %3184 = vmatprep.subr.bf16.mxu0 %v5159_v0  ;;  %381 = vst.msk [vmem:[#allocation2 + $0x171] sm:$0xff] %vm351_vm0, %v347_v42  ;;  %383 = vst.msk [vmem:[#allocation2 + $0x189] sm:$0xff] %vm351_vm0, %v349_v46  ;;  %v4143_v56 = vld [vmem:[#allocation2 + $0x3a] sm:$0xff]  ;;  %v4145_v57 = vld [vmem:[#allocation2 + $0x49] sm:$0xff]  ;;  %p3723_p3 = scmp.lt.s32.totalorder %s3721_s8, %s3715_s30 }
  0x73   : > { %v582_v59 = vld [vmem:[#allocation2 + $0x60] sm:$0xff]  ;;  %v1325_v61 = vld [vmem:[#allocation4 + $0x260] sm:$0xff]  ;;  %v1326_v63 = vld [vmem:[#allocation4 + $0x268] sm:$0xff] }
  0x74   : > { %3138 = vmatpush1.bf16.msra.mxu1 %v3137_v47  ;;  %v4130_v47 = vld [vmem:[#allocation2 + $0x32] sm:$0xff]  ;;  %v4155_v5 = vld [vmem:[#allocation2 + $0x4a] sm:$0xff]  ;;  %v1327_v10 = vld [vmem:[#allocation4 + $0x270] sm:$0xff]  ;;  %p3724_p5 = por %p3723_p3, %p3722_p1 }
  0x75   : > { %3186 = vmatpush1.bf16.msra.mxu0 %v3185_v48  ;;  %3139 = vmatprep.subr.bf16.mxu1 %v5159_v0  ;;  %v4132_v48 = vld [vmem:[#allocation2 + $0x39] sm:$0xff]  ;;  %v1357_v2 = vld [vmem:[#allocation4 + $0x360] sm:$0xff]  ;;  %v1328_v11 = vld [vmem:[#allocation4 + $0x278] sm:$0xff] }
  0x76   : > { %3187 = vmatprep.subr.bf16.mxu0 %v5159_v0  ;;  %v1358_v3 = vld [vmem:[#allocation4 + $0x368] sm:$0xff]  ;;  %v1360_v13 = vld [vmem:[#allocation4 + $0x378] sm:$0xff]  ;;  %v1329_v21 = vld [vmem:[#allocation4 + $0x280] sm:$0xff]  ;;  %p3725_p6 = pnand %p3724_p5, %p3718_p13 }
  0x77   : > { %v4157_v6 = vld [vmem:[#allocation2 + $0x51] sm:$0xff]  ;;  %v4180_v28 = vld [vmem:[#allocation2 + $0x69] sm:$0xff]  ;;  %v585_v30 = vld [vmem:[#allocation2 + $0x80] sm:$0xff] }
  0x78   : > { %3141 = vmatpush1.bf16.msra.mxu1 %v3140_v55  ;;  %v1356_v55 = vld [vmem:[#allocation4 + $0x358] sm:$0xff]  ;;  %v4167_v14 = vld [vmem:[#allocation2 + $0x52] sm:$0xff]  ;;  %v1331_v32 = vld [vmem:[#allocation4 + $0x290] sm:$0xff] }
  0x79   : > { %3189 = vmatpush1.bf16.msra.mxu0 %v3188_v58  ;;  %3318 = vmatprep.subr.bf16.mxu1 %v5159_v0  ;;  %v3206_v58 = vpack.c.bf16 %v1324_v53, %v1323_v52  ;;  %v4149_v60 = vpack.c.bf16 %v1356_v55, %v1355_v54  ;;  %v1330_v22 = vld [vmem:[#allocation4 + $0x288] sm:$0xff]  ;;  %v1361_v23 = vld [vmem:[#allocation4 + $0x380] sm:$0xff]  ;;  %v1332_v33 = vld [vmem:[#allocation4 + $0x298] sm:$0xff] }
  0x7a   : > { %3190 = vmatprep.subr.bf16.mxu0 %v5159_v0  ;;  %v1362_v24 = vld [vmem:[#allocation4 + $0x388] sm:$0xff]  ;;  %v1363_v34 = vld [vmem:[#allocation4 + $0x390] sm:$0xff]  ;;  %v1364_v35 = vld [vmem:[#allocation4 + $0x398] sm:$0xff] }
  0x7b   : > { %1458 = vmatmul.mubr.f32.vlgmr.msra.gmra.mrb[0].mxu1 %v3803_v1  ;;  %v4184_v31 = vpack.c.bf16 %v1362_v24, %v1361_v23  ;;  %v4189_v36 = vld [vmem:[#allocation2 + $0x6a] sm:$0xff]  ;;  %v4197_v42 = vpack.c.bf16 %v1364_v35, %v1363_v34  ;;  %v1334_v44 = vld [vmem:[#allocation4 + $0x2a8] sm:$0xff]  ;;  %v1335_v55 = vld [vmem:[#allocation4 + $0x2b0] sm:$0xff] }
  0x7c   : > { %1683 = vmatmul.mubr.f32.vlgmr.msra.gmra.mrb[0].mxu0 %v512_v7  ;;  %3334 = vmatpush1.bf16.msra.mxu1 %v4067_v4  ;;  %v3209_v7 = vpack.c.bf16 %v1326_v63, %v1325_v61  ;;  %v4193_v41 = vld [vmem:[#allocation2 + $0x90] sm:$0xff]  ;;  %v1366_v46 = vld [vmem:[#allocation4 + $0x3a8] sm:$0xff]  ;;  %v1368_v61 = vld [vmem:[#allocation4 + $0x3b8] sm:$0xff] }
  0x7d   : > { %3192 = vmatpush1.bf16.msra.mxu0 %v3191_v8  ;;  %1462 = vmatprep.mubr.f32.mxu1 %v449_v9  ;;  %v583_v8 = vld [vmem:[#allocation2 + $0x68] sm:$0xff]  ;;  %v4161_v9 = vpack.c.bf16 %v1358_v3, %v1357_v2  ;;  %v1333_v43 = vld [vmem:[#allocation4 + $0x2a0] sm:$0xff]  ;;  %v4207_v53 = vld [vmem:[#allocation2 + $0x98] sm:$0xff] }
  0x7e   : > { %1687 = vmatprep.mubr.f32.mxu0 %v577_v12  ;;  %3193 = vmatprep.subr.bf16.mxu0 %v5159_v0  ;;  %v1365_v45 = vld [vmem:[#allocation4 + $0x3a0] sm:$0xff]  ;;  %v3221_v52 = vpack.c.bf16 %v1334_v44, %v1333_v43  ;;  %v4217_v63 = vld [vmem:[#allocation2 + $0x82] sm:$0xff] }
  0x7f   : > { %1463 = vmatmul.mubr.f32.gmra.mrb[2].mxu1 %v3803_v1  ;;  %3319 = vmatprep.subr.bf16.mxu1 %v5159_v0  ;;  %v4094_v1 = vld [vmem:[#allocation2 + $0x38] sm:$0xff]  ;;  %v4211_v54 = vpack.c.bf16 %v1366_v46, %v1365_v45  ;;  %v1339_v24 = vld [vmem:[#allocation4 + $0x2d0] sm:$0xff]  ;;  %v4248_v34 = vld [vmem:[#allocation2 + $0xa9] sm:$0xff] }
  0x80   : > { %1688 = vmatmul.mubr.f32.gmra.mrb[2].mxu0 %v513_v15  ;;  %1467 = vmatprep.mubr.f32.mxu1 %v4077_v16  ;;  %v4169_v15 = vld [vmem:[#allocation2 + $0x61] sm:$0xff]  ;;  %v4219_v2 = vld [vmem:[#allocation2 + $0x91] sm:$0xff] }
  0x81   : > { %1692 = vmatprep.mubr.f32.mxu0 %v4079_v18  ;;  %3195 = vmatpush1.bf16.msra.mxu0 %v3194_v17  ;;  %v3212_v17 = vpack.c.bf16 %v1328_v11, %v1327_v10  ;;  %5226 = vst [vmem:[#allocation10_spill] sm:$0xff] %v4211_v54  ;;  %v1337_v10 = vld [vmem:[#allocation4 + $0x2c0] sm:$0xff]  ;;  %v1338_v11 = vld [vmem:[#allocation4 + $0x2c8] sm:$0xff] }
  0x82   : > { %3335 = vmatpush1.bf16.msra.mxu1 %v4082_v19  ;;  %3196 = vmatprep.subr.bf16.mxu0 %v5159_v0  ;;  %v1341_v44 = vld [vmem:[#allocation4 + $0x2e0] sm:$0xff]  ;;  %v1342_v45 = vld [vmem:[#allocation4 + $0x2e8] sm:$0xff] }
  0x83   : > { %1468 = vmatmul.mubr.f32.gmra.mrb[4].mxu1 %v4014_v62  ;;  %3320 = vmatprep.subr.bf16.mxu1 %v5159_v0  ;;  %v4111_v62 = vld [vmem:[#allocation2 + $0x31] sm:$0xff] }
  0x84   : > { %1693 = vmatmul.mubr.f32.gmra.mrb[4].mxu0 %v4088_v25  ;;  %1472 = vmatprep.mubr.f32.mxu1 %v4090_v26  ;;  %v1373_v46 = vld [vmem:[#allocation4 + $0x3e0] sm:$0xff] }
  0x85   : > { %1697 = vmatprep.mubr.f32.mxu0 %v4094_v1  ;;  %3198 = vmatpush1.bf16.msra.mxu0 %v3197_v27  ;;  %v4178_v27 = vld [vmem:[#allocation2 + $0x62] sm:$0xff] }
  0x86   : > { %3336 = vmatpush1.bf16.msra.mxu1 %v4097_v29  ;;  %3199 = vmatprep.subr.bf16.mxu0 %v5159_v0 }
  0x87   : > { %1473 = vmatmul.mubr.f32.gmra.mrb[6].mxu1 %v577_v12  ;;  %3321 = vmatprep.subr.bf16.mxu1 %v5159_v0  ;;  %v1359_v12 = vld [vmem:[#allocation4 + $0x370] sm:$0xff] }
  0x88   : > { %1698 = vmatmul.mubr.f32.gmra.mrb[6].mxu0 %v4109_v37  ;;  %1477 = vmatprep.mubr.f32.mxu1 %v4111_v62  ;;  %v4173_v20 = vpack.c.bf16 %v1360_v13, %v1359_v12  ;;  %v1369_v12 = vld [vmem:[#allocation4 + $0x3c0] sm:$0xff]  ;;  %v1370_v13 = vld [vmem:[#allocation4 + $0x3c8] sm:$0xff] }
  0x89   : > { %1702 = vmatprep.mubr.f32.mxu0 %v4113_v38  ;;  %3201 = vmatpush1.bf16.msra.mxu0 %v3200_v39  ;;  %v3218_v39 = vpack.c.bf16 %v1332_v33, %v1331_v32  ;;  %v4239_v23 = vpack.c.bf16 %v1370_v13, %v1369_v12  ;;  %v1372_v32 = vld [vmem:[#allocation4 + $0x3d8] sm:$0xff]  ;;  %v4246_v33 = vld [vmem:[#allocation2 + $0x9a] sm:$0xff] }
  0x8a   : > { %3337 = vmatpush1.bf16.msra.mxu1 %v4119_v40  ;;  %3202 = vmatprep.subr.bf16.mxu0 %v5159_v0  ;;  %5229 = vst [vmem:[#allocation13_spill] sm:$0xff] %v4246_v33  ;;  %v1375_v12 = vld [vmem:[#allocation4 + $0x3f0] sm:$0xff]  ;;  %v1376_v13 = vld [vmem:[#allocation4 + $0x3f8] sm:$0xff] }
  0x8b   : > { %1478 = vmatmul.mubr.f32.gmra.mrb[8].mxu1 %v4079_v18  ;;  %3322 = vmatprep.subr.bf16.mxu1 %v5159_v0  ;;  %v584_v18 = vld [vmem:[#allocation2 + $0x78] sm:$0xff]  ;;  %5228 = vst [vmem:[#allocation12_spill] sm:$0xff] %v4239_v23 }
  0x8c   : > { %1703 = vmatmul.mubr.f32.gmra.mrb[8].mxu0 %v4130_v47  ;;  %1482 = vmatprep.mubr.f32.mxu1 %v4132_v48 }
  0x8d   : > { %1707 = vmatprep.mubr.f32.mxu0 %v581_v50  ;;  %3204 = vmatpush1.bf16.msra.mxu0 %v3203_v49  ;;  %v4203_v49 = vld [vmem:[#allocation2 + $0x7a] sm:$0xff] }
  0x8e   : > { %3338 = vmatpush1.bf16.msra.mxu1 %v4137_v51  ;;  %3205 = vmatprep.subr.bf16.mxu0 %v5159_v0 }
  0x8f   : > { %1483 = vmatmul.mubr.f32.gmra.mrb[10].mxu1 %v4094_v1  ;;  %3323 = vmatprep.subr.bf16.mxu1 %v5159_v0  ;;  %v3215_v1 = vpack.c.bf16 %v1330_v22, %v1329_v21  ;;  %v3227_v21 = vpack.c.bf16 %v1338_v11, %v1337_v10  ;;  %v4235_v22 = vld [vmem:[#allocation2 + $0xb0] sm:$0xff]  ;;  %v1343_v10 = vld [vmem:[#allocation4 + $0x2f0] sm:$0xff]  ;;  %v1344_v11 = vld [vmem:[#allocation4 + $0x2f8] sm:$0xff] }
  0x90   : > { %1708 = vmatmul.mubr.f32.gmra.mrb[10].mxu0 %v4143_v56  ;;  %1487 = vmatprep.mubr.f32.mxu1 %v4145_v57 }
  0x91   : > { %1712 = vmatprep.mubr.f32.mxu0 %v582_v59  ;;  %3207 = vmatpush1.bf16.msra.mxu0 %v3206_v58  ;;  %v1336_v58 = vld [vmem:[#allocation4 + $0x2b8] sm:$0xff] }
  0x92   : > { %3339 = vmatpush1.bf16.msra.mxu1 %v4149_v60  ;;  %3208 = vmatprep.subr.bf16.mxu0 %v5159_v0  ;;  %v3224_v3 = vpack.c.bf16 %v1336_v58, %v1335_v55  ;;  %v4261_v55 = vld [vmem:[#allocation2 + $0xaa] sm:$0xff] }
  0x93   : > { %1488 = vmatmul.mubr.f32.gmra.mrb[12].mxu1 %v4113_v38  ;;  %3324 = vmatprep.subr.bf16.mxu1 %v5159_v0  ;;  %v4191_v38 = vld [vmem:[#allocation2 + $0x79] sm:$0xff]  ;;  %5231 = vst [vmem:[#allocation15_spill] sm:$0xff] %v4261_v55  ;;  %v4263_v58 = vld [vmem:[#allocation2 + $0xb1] sm:$0xff] }
  0x94   : > { %1713 = vmatmul.mubr.f32.gmra.mrb[12].mxu0 %v4155_v5  ;;  %1492 = vmatprep.mubr.f32.mxu1 %v4157_v6 }
  0x95   : > { %1717 = vmatprep.mubr.f32.mxu0 %v583_v8  ;;  %3210 = vmatpush1.bf16.msra.mxu0 %v3209_v7  ;;  %v4221_v7 = vld [vmem:[#allocation2 + $0xa8] sm:$0xff] }
  0x96   : > { %3340 = vmatpush1.bf16.msra.mxu1 %v4161_v9  ;;  %3211 = vmatprep.subr.bf16.mxu0 %v5159_v0 }
  0x97   : > { %1493 = vmatmul.mubr.f32.gmra.mrb[14].mxu1 %v581_v50  ;;  %3325 = vmatprep.subr.bf16.mxu1 %v5159_v0  ;;  %v4205_v50 = vld [vmem:[#allocation2 + $0x81] sm:$0xff] }
  0x98   : > { %1718 = vmatmul.mubr.f32.gmra.mrb[14].mxu0 %v4167_v14  ;;  %1497 = vmatprep.mubr.f32.mxu1 %v4169_v15 }
  0x99   : > { %1722 = vmatprep.mubr.f32.mxu0 %v584_v18  ;;  %3213 = vmatpush1.bf16.msra.mxu0 %v3212_v17  ;;  %v4231_v17 = vld [vmem:[#allocation2 + $0x92] sm:$0xff] }
  0x9a   : > { %3341 = vmatpush1.bf16.msra.mxu1 %v4173_v20  ;;  %3214 = vmatprep.subr.bf16.mxu0 %v5159_v0 }
  0x9b   : > { %1498 = vmatmul.mubr.f32.gmra.mrb[16].mxu1 %v582_v59  ;;  %3326 = vmatprep.subr.bf16.mxu1 %v5159_v0  ;;  %v1367_v59 = vld [vmem:[#allocation4 + $0x3b0] sm:$0xff] }
  0x9c   : > { %1723 = vmatmul.mubr.f32.gmra.mrb[16].mxu0 %v4178_v27  ;;  %1502 = vmatprep.mubr.f32.mxu1 %v4180_v28 }
  0x9d   : > { %1727 = vmatprep.mubr.f32.mxu0 %v585_v30  ;;  %3216 = vmatpush1.bf16.msra.mxu0 %v3215_v1  ;;  %v1340_v1 = vld [vmem:[#allocation4 + $0x2d8] sm:$0xff] }
  0x9e   : > { %3342 = vmatpush1.bf16.msra.mxu1 %v4184_v31  ;;  %3217 = vmatprep.subr.bf16.mxu0 %v5159_v0  ;;  %v3230_v35 = vpack.c.bf16 %v1340_v1, %v1339_v24  ;;  %v1378_v24 = vld [vmem:[#allocation4 + $0x408] sm:$0xff] }
  0x9f   : > { %1503 = vmatmul.mubr.f32.gmra.mrb[18].mxu1 %v583_v8  ;;  %3327 = vmatprep.subr.bf16.mxu1 %v5159_v0  ;;  %v4225_v8 = vpack.c.bf16 %v1368_v61, %v1367_v59  ;;  %v3233_v59 = vpack.c.bf16 %v1342_v45, %v1341_v44  ;;  %v4265_v61 = vld [vmem:[#allocation2 + $0xc8] sm:$0xff]  ;;  %v4276_v1 = vld [vmem:[#allocation2 + $0xb2] sm:$0xff]  ;;  %v4284_v44 = vpack.c.bf16 %v1376_v13, %v1375_v12  ;;  %v4316_v13 = vld [vmem:[#allocation2 + $0xda] sm:$0xff] }
  0xa0   : > { %1728 = vmatmul.mubr.f32.gmra.mrb[18].mxu0 %v4189_v36  ;;  %1507 = vmatprep.mubr.f32.mxu1 %v4191_v38  ;;  %5233 = vst [vmem:[#allocation17_spill] sm:$0xff] %v4276_v1  ;;  %v4310_v12 = vld [vmem:[#allocation2 + $0xf0] sm:$0xff]  ;;  %5237 = vst [vmem:[#allocation21_spill] sm:$0xff] %v4316_v13 }
  0xa1   : > { %1732 = vmatprep.mubr.f32.mxu0 %v4193_v41  ;;  %3219 = vmatpush1.bf16.msra.mxu0 %v3218_v39  ;;  %5227 = vst [vmem:[#allocation11_spill] sm:$0xff] %v4225_v8  ;;  %v4250_v39 = vld [vmem:[#allocation2 + $0xc0] sm:$0xff]  ;;  %5234 = vst [vmem:[#allocation18_spill] sm:$0xff] %v4284_v44 }
  0xa2   : > { %3343 = vmatpush1.bf16.msra.mxu1 %v4197_v42  ;;  %3220 = vmatprep.subr.bf16.mxu0 %v5159_v0 }
  0xa3   : > { %1508 = vmatmul.mubr.f32.gmra.mrb[20].mxu1 %v584_v18  ;;  %3328 = vmatprep.subr.bf16.mxu1 %v5159_v0  ;;  %v4233_v18 = vld [vmem:[#allocation2 + $0x99] sm:$0xff] }
  0xa4   : > { %1733 = vmatmul.mubr.f32.gmra.mrb[20].mxu0 %v4203_v49  ;;  %1512 = vmatprep.mubr.f32.mxu1 %v4205_v50 }
  0xa5   : > { %1737 = vmatprep.mubr.f32.mxu0 %v4207_v53  ;;  %3222 = vmatpush1.bf16.msra.mxu0 %v3221_v52  ;;  %v1374_v52 = vld [vmem:[#allocation4 + $0x3e8] sm:$0xff] }
  0xa6   : > { %3344 = vmatpush1.bf16.msra.mxu1 %v4211_v54  ;;  %3223 = vmatprep.subr.bf16.mxu0 %v5159_v0  ;;  %v4376_v54 = vld [vmem:[#allocation2 + $0x122] sm:$0xff] }
  0xa7   : > { %1513 = vmatmul.mubr.f32.gmra.mrb[22].mxu1 %v585_v30  ;;  %3329 = vmatprep.subr.bf16.mxu1 %v5159_v0  ;;  %v1371_v30 = vld [vmem:[#allocation4 + $0x3d0] sm:$0xff]  ;;  %5248 = vst [vmem:[#allocation32_spill] sm:$0xff] %v4376_v54 }
  0xa8   : > { %1738 = vmatmul.mubr.f32.gmra.mrb[22].mxu0 %v4217_v63  ;;  %1517 = vmatprep.mubr.f32.mxu1 %v4219_v2  ;;  %v4254_v43 = vpack.c.bf16 %v1372_v32, %v1371_v30  ;;  %v4278_v30 = vld [vmem:[#allocation2 + $0xc1] sm:$0xff]  ;;  %v3236_v32 = vpack.c.bf16 %v1344_v11, %v1343_v10  ;;  %v4306_v10 = vld [vmem:[#allocation2 + $0xca] sm:$0xff]  ;;  %v4308_v11 = vld [vmem:[#allocation2 + $0xd9] sm:$0xff] }
  0xa9   : > { %1742 = vmatprep.mubr.f32.mxu0 %v4221_v7  ;;  %3225 = vmatpush1.bf16.msra.mxu0 %v3224_v3  ;;  %v4269_v3 = vpack.c.bf16 %v1374_v52, %v1373_v46  ;;  %v4293_v46 = vld [vmem:[#allocation2 + $0xc2] sm:$0xff]  ;;  %5236 = vst [vmem:[#allocation20_spill] sm:$0xff] %v4306_v10 }
  0xaa   : > { %3345 = vmatpush1.bf16.msra.mxu1 %v4225_v8  ;;  %3226 = vmatprep.subr.bf16.mxu0 %v5159_v0  ;;  %5230 = vst [vmem:[#allocation14_spill] sm:$0xff] %v4254_v43  ;;  %5235 = vst [vmem:[#allocation19_spill] sm:$0xff] %v4293_v46  ;;  %v4295_v52 = vld [vmem:[#allocation2 + $0xc9] sm:$0xff]  ;;  %v4366_v8 = vld [vmem:[#allocation2 + $0x112] sm:$0xff] }
  0xab   : > { %1518 = vmatmul.mubr.f32.gmra.mrb[24].mxu1 %v4193_v41  ;;  %3330 = vmatprep.subr.bf16.mxu1 %v5159_v0  ;;  %5232 = vst [vmem:[#allocation16_spill] sm:$0xff] %v4269_v3  ;;  %5245 = vst [vmem:[#allocation29_spill] sm:$0xff] %v4366_v8 }
  0xac   : > { %1743 = vmatmul.mubr.f32.gmra.mrb[24].mxu0 %v4231_v17  ;;  %1522 = vmatprep.mubr.f32.mxu1 %v4233_v18 }
  0xad   : > { %1747 = vmatprep.mubr.f32.mxu0 %v4235_v22  ;;  %3228 = vmatpush1.bf16.msra.mxu0 %v3227_v21  ;;  %v1377_v21 = vld [vmem:[#allocation4 + $0x400] sm:$0xff] }
  0xae   : > { %3346 = vmatpush1.bf16.msra.mxu1 %v4239_v23  ;;  %3229 = vmatprep.subr.bf16.mxu0 %v5159_v0  ;;  %v4288_v45 = vpack.c.bf16 %v1378_v24, %v1377_v21  ;;  %v4318_v21 = vld [vmem:[#allocation2 + $0xe1] sm:$0xff]  ;;  %v4320_v24 = vld [vmem:[#allocation2 + $0xf8] sm:$0xff]  ;;  %v4356_v23 = vld [vmem:[#allocation2 + $0x10a] sm:$0xff] }
  0xaf   : > { %1523 = vmatmul.mubr.f32.gmra.mrb[26].mxu1 %v4207_v53  ;;  %3331 = vmatprep.subr.bf16.mxu1 %v5159_v0  ;;  %5243 = vst [vmem:[#allocation27_spill] sm:$0xff] %v4356_v23 }
  0xb0   : > { %1748 = vmatmul.mubr.f32.gmra.mrb[26].mxu0 %v4246_v33  ;;  %1527 = vmatprep.mubr.f32.mxu1 %v4248_v34  ;;  %v4380_v33 = vld [vmem:[#allocation2 + $0x140] sm:$0xff] }
  0xb1   : > { %1752 = vmatprep.mubr.f32.mxu0 %v4250_v39  ;;  %3231 = vmatpush1.bf16.msra.mxu0 %v3230_v35  ;;  %v4280_v35 = vld [vmem:[#allocation2 + $0xd8] sm:$0xff]  ;;  %5250 = vst [vmem:[#allocation34_spill] sm:$0xff] %v4380_v33 }
  0xb2   : > { %3347 = vmatpush1.bf16.msra.mxu1 %v4254_v43  ;;  %3232 = vmatprep.subr.bf16.mxu0 %v5159_v0  ;;  %v4346_v43 = vld [vmem:[#allocation2 + $0xfa] sm:$0xff] }
  0xb3   : > { %1528 = vmatmul.mubr.f32.gmra.mrb[28].mxu1 %v4221_v7  ;;  %3332 = vmatprep.subr.bf16.mxu1 %v5159_v0  ;;  %5241 = vst [vmem:[#allocation25_spill] sm:$0xff] %v4346_v43 }
  0xb4   : > { %1753 = vmatmul.mubr.f32.gmra.mrb[28].mxu0 %v4261_v55  ;;  %1532 = vmatprep.mubr.f32.mxu1 %v4263_v58  ;;  %v4370_v55 = vld [vmem:[#allocation2 + $0x138] sm:$0xff] }
  0xb5   : > { %1757 = vmatprep.mubr.f32.mxu0 %v4265_v61  ;;  %3234 = vmatpush1.bf16.msra.mxu0 %v3233_v59  ;;  %v4297_v59 = vld [vmem:[#allocation2 + $0xe0] sm:$0xff]  ;;  %5247 = vst [vmem:[#allocation31_spill] sm:$0xff] %v4370_v55 }
  0xb6   : > { %3348 = vmatpush1.bf16.msra.mxu1 %v4269_v3  ;;  %3235 = vmatprep.subr.bf16.mxu0 %v5159_v0  ;;  %v4336_v3 = vld [vmem:[#allocation2 + $0xf2] sm:$0xff] }
  0xb7   : > { %1533 = vmatmul.mubr.f32.gmra.mrb[30].mxu1 %v4235_v22  ;;  %3333 = vmatprep.subr.bf16.mxu1 %v5159_v0  ;;  %5239 = vst [vmem:[#allocation23_spill] sm:$0xff] %v4336_v3 }
  0xb8   : > { %1758 = vmatmul.mubr.f32.gmra.mrb[30].mxu0 %v4276_v1  ;;  %1537 = vmatprep.mubr.f32.mxu1 %v4278_v30  ;;  %v4360_v1 = vld [vmem:[#allocation2 + $0x128] sm:$0xff] }
  0xb9   : > { %1762 = vmatprep.mubr.f32.mxu0 %v4280_v35  ;;  %3237 = vmatpush1.bf16.msra.mxu0 %v3236_v32  ;;  %v4326_v32 = vld [vmem:[#allocation2 + $0xe2] sm:$0xff]  ;;  %5244 = vst [vmem:[#allocation28_spill] sm:$0xff] %v4360_v1 }
  0xba   : > { %3349 = vmatpush1.bf16.msra.mxu1 %v4284_v44  ;;  %3238 = vmatprep.subr.bf16.mxu0 %v5159_v0  ;;  %5238 = vst [vmem:[#allocation22_spill] sm:$0xff] %v4326_v32  ;;  %v4328_v0 = vld [vmem:[#allocation2 + $0xf1] sm:$0xff]  ;;  %v4330_v44 = vld [vmem:[#allocation2 + $0x108] sm:$0xff] }
  0xbb   : > { %1538 = vmatmul.mubr.f32.gmra.mrb[32].mxu1 %v4250_v39  ;;  %3287 = vmatprep.subr.bf16.mxu1 %v4288_v45 }
  0xbc   : > { %1763 = vmatmul.mubr.f32.gmra.mrb[32].mxu0 %v4293_v46  ;;  %1542 = vmatprep.mubr.f32.mxu1 %v4295_v52  ;;  %v4350_v46 = vld [vmem:[#allocation2 + $0x120] sm:$0xff] }
  0xbd   : > { %1767 = vmatprep.mubr.f32.mxu0 %v4297_v59  ;;  %5242 = vst [vmem:[#allocation26_spill] sm:$0xff] %v4350_v46 }
  0xbf   : > { %1543 = vmatmul.mubr.f32.gmra.mrb[34].mxu1 %v4265_v61 }
  0xc0   : > { %1768 = vmatmul.mubr.f32.gmra.mrb[34].mxu0 %v4306_v10  ;;  %1547 = vmatprep.mubr.f32.mxu1 %v4308_v11  ;;  %v4340_v10 = vld [vmem:[#allocation2 + $0x110] sm:$0xff] }
  0xc1   : > { %1772 = vmatprep.mubr.f32.mxu0 %v4310_v12  ;;  %5240 = vst [vmem:[#allocation24_spill] sm:$0xff] %v4340_v10 }
  0xc3   : > { %1548 = vmatmul.mubr.f32.gmra.mrb[36].mxu1 %v4280_v35 }
  0xc4   : > { %1773 = vmatmul.mubr.f32.gmra.mrb[36].mxu0 %v4316_v13  ;;  %1552 = vmatprep.mubr.f32.mxu1 %v4318_v21  ;;  %v4338_v13 = vld [vmem:[#allocation2 + $0xf9] sm:$0xff] }
  0xc5   : > { %1777 = vmatprep.mubr.f32.mxu0 %v4320_v24 }
  0xc7   : > { %1553 = vmatmul.mubr.f32.gmra.mrb[38].mxu1 %v4297_v59 }
  0xc8   : > { %1778 = vmatmul.mubr.f32.gmra.mrb[38].mxu0 %v4326_v32  ;;  %1557 = vmatprep.mubr.f32.mxu1 %v4328_v0  ;;  %v4348_v32 = vld [vmem:[#allocation2 + $0x109] sm:$0xff] }
  0xc9   : > { %1782 = vmatprep.mubr.f32.mxu0 %v4330_v44 }
  0xcb   : > { %1558 = vmatmul.mubr.f32.gmra.mrb[40].mxu1 %v4310_v12 }
  0xcc   : > { %1783 = vmatmul.mubr.f32.gmra.mrb[40].mxu0 %v4336_v3  ;;  %1562 = vmatprep.mubr.f32.mxu1 %v4338_v13  ;;  %v4358_v3 = vld [vmem:[#allocation2 + $0x111] sm:$0xff] }
  0xcd   : > { %1787 = vmatprep.mubr.f32.mxu0 %v4340_v10 }
  0xcf   : > { %1563 = vmatmul.mubr.f32.gmra.mrb[42].mxu1 %v4320_v24 }
  0xd0   : > { %1788 = vmatmul.mubr.f32.gmra.mrb[42].mxu0 %v4346_v43  ;;  %1567 = vmatprep.mubr.f32.mxu1 %v4348_v32  ;;  %v4368_v43 = vld [vmem:[#allocation2 + $0x121] sm:$0xff] }
  0xd1   : > { %1792 = vmatprep.mubr.f32.mxu0 %v4350_v46  ;;  %5246 = vst [vmem:[#allocation30_spill] sm:$0xff] %v4368_v43 }
  0xd3   : > { %1568 = vmatmul.mubr.f32.gmra.mrb[44].mxu1 %v4330_v44 }
  0xd4   : > { %1793 = vmatmul.mubr.f32.gmra.mrb[44].mxu0 %v4356_v23  ;;  %1572 = vmatprep.mubr.f32.mxu1 %v4358_v3  ;;  %v4378_v23 = vld [vmem:[#allocation2 + $0x129] sm:$0xff] }
  0xd5   : > { %1797 = vmatprep.mubr.f32.mxu0 %v4360_v1  ;;  %5249 = vst [vmem:[#allocation33_spill] sm:$0xff] %v4378_v23 }
  0xd7   : > { %1573 = vmatmul.mubr.f32.gmra.mrb[46].mxu1 %v4340_v10  ;;  %v4386_v10 = vld [vmem:[#allocation2 + $0x12a] sm:$0xff] }
  0xd8   : > { %1798 = vmatmul.mubr.f32.gmra.mrb[46].mxu0 %v4366_v8  ;;  %1577 = vmatprep.mubr.f32.mxu1 %v4368_v43  ;;  %5251 = vst [vmem:[#allocation35_spill] sm:$0xff] %v4386_v10  ;;  %v4388_v8 = vld [vmem:[#allocation2 + $0x139] sm:$0xff]  ;;  %v4390_v43 = vld [vmem:[#allocation2 + $0x150] sm:$0xff] }
  0xd9   : > { %1802 = vmatprep.mubr.f32.mxu0 %v4370_v55  ;;  %5252 = vst [vmem:[#allocation36_spill] sm:$0xff] %v4388_v8  ;;  %5253 = vst [vmem:[#allocation37_spill] sm:$0xff] %v4390_v43 }
  0xdb   : > { %1578 = vmatmul.mubr.f32.gmra.mrb[48].mxu1 %v4350_v46  ;;  %v4396_v46 = vld [vmem:[#allocation2 + $0x13a] sm:$0xff] }
  0xdc   : > { %1803 = vmatmul.mubr.f32.gmra.mrb[48].mxu0 %v4376_v54  ;;  %1582 = vmatprep.mubr.f32.mxu1 %v4378_v23  ;;  %5254 = vst [vmem:[#allocation38_spill] sm:$0xff] %v4396_v46  ;;  %v4398_v54 = vld [vmem:[#allocation2 + $0x141] sm:$0xff]  ;;  %v4400_v23 = vld [vmem:[#allocation2 + $0x158] sm:$0xff] }
  0xdd   : > { %1807 = vmatprep.mubr.f32.mxu0 %v4380_v33  ;;  %5255 = vst [vmem:[#allocation39_spill] sm:$0xff] %v4398_v54  ;;  %5256 = vst [vmem:[#allocation40_spill] sm:$0xff] %v4400_v23 }
  0xdf   : > { %1583 = vmatmul.mubr.f32.gmra.mrb[50].mxu1 %v4360_v1  ;;  %v4406_v1 = vld [vmem:[#allocation2 + $0x142] sm:$0xff] }
  0xe0   : > { %1808 = vmatmul.mubr.f32.gmra.mrb[50].mxu0 %v4386_v10  ;;  %1587 = vmatprep.mubr.f32.mxu1 %v4388_v8  ;;  %5257 = vst [vmem:[#allocation41_spill] sm:$0xff] %v4406_v1  ;;  %v4408_v10 = vld [vmem:[#allocation2 + $0x151] sm:$0xff]  ;;  %v4410_v8 = vld [vmem:[#allocation2 + $0x168] sm:$0xff] }
  0xe1   : > { %1812 = vmatprep.mubr.f32.mxu0 %v4390_v43  ;;  %5258 = vst [vmem:[#allocation42_spill] sm:$0xff] %v4408_v10  ;;  %5259 = vst [vmem:[#allocation43_spill] sm:$0xff] %v4410_v8 }
  0xe3   : > { %1588 = vmatmul.mubr.f32.gmra.mrb[52].mxu1 %v4370_v55  ;;  %v4416_v55 = vld [vmem:[#allocation2 + $0x152] sm:$0xff] }
  0xe4   : > { %1813 = vmatmul.mubr.f32.gmra.mrb[52].mxu0 %v4396_v46  ;;  %1592 = vmatprep.mubr.f32.mxu1 %v4398_v54  ;;  %5260 = vst [vmem:[#allocation44_spill] sm:$0xff] %v4416_v55  ;;  %v4418_v46 = vld [vmem:[#allocation2 + $0x159] sm:$0xff]  ;;  %v4420_v54 = vld [vmem:[#allocation2 + $0x170] sm:$0xff] }
  0xe5   : > { %1817 = vmatprep.mubr.f32.mxu0 %v4400_v23  ;;  %5261 = vst [vmem:[#allocation45_spill] sm:$0xff] %v4418_v46 }
  0xe7   : > { %1593 = vmatmul.mubr.f32.gmra.mrb[54].mxu1 %v4380_v33  ;;  %v4426_v33 = vld [vmem:[#allocation2 + $0x15a] sm:$0xff] }
  0xe8   : > { %1818 = vmatmul.mubr.f32.gmra.mrb[54].mxu0 %v4406_v1  ;;  %1597 = vmatprep.mubr.f32.mxu1 %v4408_v10  ;;  %5262 = vst [vmem:[#allocation46_spill] sm:$0xff] %v4426_v33  ;;  %v4428_v1 = vld [vmem:[#allocation2 + $0x169] sm:$0xff]  ;;  %v4430_v10 = vld [vmem:[#allocation2 + $0x180] sm:$0xff] }
  0xe9   : > { %1822 = vmatprep.mubr.f32.mxu0 %v4410_v8  ;;  %5263 = vst [vmem:[#allocation47_spill] sm:$0xff] %v4430_v10 }
  0xeb   : > { %1598 = vmatmul.mubr.f32.gmra.mrb[56].mxu1 %v4390_v43  ;;  %v4436_v43 = vld [vmem:[#allocation2 + $0x16a] sm:$0xff] }
  0xec   : > { %1823 = vmatmul.mubr.f32.gmra.mrb[56].mxu0 %v4416_v55  ;;  %1602 = vmatprep.mubr.f32.mxu1 %v4418_v46  ;;  %5264 = vst [vmem:[#allocation48_spill] sm:$0xff] %v4436_v43  ;;  %v4438_v55 = vld [vmem:[#allocation2 + $0x171] sm:$0xff]  ;;  %v4440_v46 = vld [vmem:[#allocation2 + $0x188] sm:$0xff] }
  0xed   : > { %1827 = vmatprep.mubr.f32.mxu0 %v4420_v54  ;;  %5265 = vst [vmem:[#allocation49_spill] sm:$0xff] %v4440_v46 }
  0xef   : > { %1603 = vmatmul.mubr.f32.gmra.mrb[58].mxu1 %v4400_v23  ;;  %v4446_v23 = vld [vmem:[#allocation2 + $0x172] sm:$0xff] }
  0xf0   : > { %1828 = vmatmul.mubr.f32.gmra.mrb[58].mxu0 %v4426_v33  ;;  %1607 = vmatprep.mubr.f32.mxu1 %v4428_v1  ;;  %5266 = vst [vmem:[#allocation50_spill] sm:$0xff] %v4446_v23  ;;  %v1379_v33 = vld [vmem:[#allocation4 + $0x410] sm:$0xff] }
  0xf1   : > { %1832 = vmatprep.mubr.f32.mxu0 %v4430_v10  ;;  %v1380_v10 = vld [vmem:[#allocation4 + $0x418] sm:$0xff] }
  0xf3   : > { %1608 = vmatmul.mubr.f32.gmra.mrb[60].mxu1 %v4410_v8  ;;  %v3290_v8 = vpack.c.bf16 %v1380_v10, %v1379_v33  ;;  %v5290_v33 = vld [vmem:[#allocation37_spill] sm:$0xff]  ;;  %v5301_v10 = vld [vmem:[#allocation32_spill] sm:$0xff] }
  0xf4   : > { %1833 = vmatmul.mubr.f32.gmra.mrb[60].mxu0 %v4436_v43  ;;  %1612 = vmatprep.mubr.f32.mxu1 %v4438_v55  ;;  %v1381_v43 = vld [vmem:[#allocation4 + $0x420] sm:$0xff] }
  0xf5   : > { %1837 = vmatprep.mubr.f32.mxu0 %v4440_v46  ;;  %v1382_v46 = vld [vmem:[#allocation4 + $0x428] sm:$0xff] }
  0xf7   : > { %1613 = vmatmul.mubr.f32.gmra.mrb[62].mxu1 %v4420_v54 }
  0xf8   : > { %1838 = vmatmul.mubr.f32.gmra.mrb[62].mxu0 %v4446_v23  ;;  %2172 = vmatprep.mubr.f32.mxu1 %v4219_v2  ;;  %v5267_v23 = vmov 0.0|0.0  }
  0xf9   : > { %1907 = vmatprep.mubr.f32.mxu0 %v4088_v25  ;;  %v3294_v25 = vpack.c.bf16 %v1382_v46, %v1381_v43  ;;  %v5293_v43 = vld [vmem:[#allocation40_spill] sm:$0xff] }
  0xfa   : > { %v863_v46 = vld [vmem:[#allocation2 + $0x199] sm:$0xff] }
  0xfb   : > { %2173 = vmatmul.mubr.f32.vlgmr.msra.gmra.mrb[64].mxu1 %v4193_v41  ;;  %v1384_v41 = vld [vmem:[#allocation4 + $0x438] sm:$0xff] }
  0xfc   : > { %1908 = vmatmul.mubr.f32.vlgmr.msra.gmra.mrb[0].mxu0 %v4077_v16  ;;  %3289 = vmatpush3.bf16.msra.mxu1 %v4288_v45  ;;  %v1383_v16 = vld [vmem:[#allocation4 + $0x430] sm:$0xff]  ;;  %v5298_v45 = vld [vmem:[#allocation47_spill] sm:$0xff] }
  0xfd   : > { %3240 = vmatpush1.bf16.msra.mxu0 %v4067_v4  ;;  %1912 = vmatprep.mubr.f32.mxu0 %v4109_v37  ;;  %v3298_v4 = vpack.c.bf16 %v1384_v41, %v1383_v16  ;;  %v1386_v37 = vld [vmem:[#allocation4 + $0x448] sm:$0xff]  ;;  %v5303_v41 = vld [vmem:[#allocation38_spill] sm:$0xff] }
  0xfe   : > { %2177 = vmatprep.mubr.f32.mxu1 %v4233_v18  ;;  %3241 = vmatprep.subr.bf16.mxu0 %v5267_v23 }
  0xff   : > { %2178 = vmatmul.mubr.f32.gmra.mrb[66].mxu1 %v4207_v53  ;;  %3291 = vmatprep.subr.bf16.mxu1 %v3290_v8  ;;  %v5282_v53 = vld [vmem:[#allocation31_spill] sm:$0xff] }
 0x100   : > { %1913 = vmatmul.mubr.f32.gmra.mrb[2].mxu0 %v4090_v26  ;;  %2182 = vmatprep.mubr.f32.mxu1 %v4248_v34  ;;  %v1385_v26 = vld [vmem:[#allocation4 + $0x440] sm:$0xff] }
 0x101   : > { %1917 = vmatprep.mubr.f32.mxu0 %v4130_v47  ;;  %3243 = vmatpush1.bf16.msra.mxu0 %v4082_v19  ;;  %v3302_v19 = vpack.c.bf16 %v1386_v37, %v1385_v26  ;;  %v1388_v47 = vld [vmem:[#allocation4 + $0x458] sm:$0xff] }
 0x102   : > { %3293 = vmatpush3.bf16.msra.mxu1 %v3290_v8  ;;  %3244 = vmatprep.subr.bf16.mxu0 %v5267_v23  ;;  %v5286_v8 = vld [vmem:[#allocation34_spill] sm:$0xff] }
 0x103   : > { %2183 = vmatmul.mubr.f32.gmra.mrb[68].mxu1 %v4221_v7  ;;  %3295 = vmatprep.subr.bf16.mxu1 %v3294_v25  ;;  %v5285_v7 = vld [vmem:[#allocation16_spill] sm:$0xff] }
 0x104   : > { %1918 = vmatmul.mubr.f32.gmra.mrb[4].mxu0 %v4111_v62  ;;  %2187 = vmatprep.mubr.f32.mxu1 %v4263_v58  ;;  %v1387_v62 = vld [vmem:[#allocation4 + $0x450] sm:$0xff] }
 0x105   : > { %1922 = vmatprep.mubr.f32.mxu0 %v4143_v56  ;;  %3246 = vmatpush1.bf16.msra.mxu0 %v4097_v29  ;;  %v3306_v29 = vpack.c.bf16 %v1388_v47, %v1387_v62  ;;  %v1390_v56 = vld [vmem:[#allocation4 + $0x468] sm:$0xff]  ;;  %v5304_v62 = vld [vmem:[#allocation41_spill] sm:$0xff] }
 0x106   : > { %3247 = vmatprep.subr.bf16.mxu0 %v5267_v23  ;;  %3297 = vmatpush3.bf16.msra.mxu1 %v3294_v25  ;;  %v901_v47 = vld [vmem:[#allocation2 + $0x62] sm:$0xff] }
 0x107   : > { %2188 = vmatmul.mubr.f32.gmra.mrb[70].mxu1 %v4235_v22  ;;  %3299 = vmatprep.subr.bf16.mxu1 %v3298_v4  ;;  %v5289_v22 = vld [vmem:[#allocation18_spill] sm:$0xff] }
 0x108   : > { %1923 = vmatmul.mubr.f32.gmra.mrb[6].mxu0 %v4132_v48  ;;  %2192 = vmatprep.mubr.f32.mxu1 %v4278_v30  ;;  %v1389_v48 = vld [vmem:[#allocation4 + $0x460] sm:$0xff] }
 0x109   : > { %1927 = vmatprep.mubr.f32.mxu0 %v4155_v5  ;;  %3249 = vmatpush1.bf16.msra.mxu0 %v4119_v40  ;;  %v3310_v40 = vpack.c.bf16 %v1390_v56, %v1389_v48  ;;  %v1392_v5 = vld [vmem:[#allocation4 + $0x478] sm:$0xff] }
 0x10a   : > { %3250 = vmatprep.subr.bf16.mxu0 %v5267_v23  ;;  %3301 = vmatpush3.bf16.msra.mxu1 %v3298_v4  ;;  %v899_v4 = vld [vmem:[#allocation2 + $0x4a] sm:$0xff] }
 0x10b   : > { %2193 = vmatmul.mubr.f32.gmra.mrb[72].mxu1 %v4250_v39  ;;  %3303 = vmatprep.subr.bf16.mxu1 %v3302_v19  ;;  %v5292_v39 = vld [vmem:[#allocation22_spill] sm:$0xff] }
 0x10c   : > { %1928 = vmatmul.mubr.f32.gmra.mrb[8].mxu0 %v4145_v57  ;;  %2197 = vmatprep.mubr.f32.mxu1 %v4295_v52  ;;  %v1391_v57 = vld [vmem:[#allocation4 + $0x470] sm:$0xff]  ;;  %v902_v56 = vld [vmem:[#allocation2 + $0x6a] sm:$0xff] }
 0x10d   : > { %1932 = vmatprep.mubr.f32.mxu0 %v4167_v14  ;;  %3252 = vmatpush1.bf16.msra.mxu0 %v4137_v51  ;;  %v3314_v51 = vpack.c.bf16 %v1392_v5, %v1391_v57  ;;  %v5271_v14 = vld [vmem:[#allocation30_spill] sm:$0xff]  ;;  %v903_v57 = vld [vmem:[#allocation2 + $0x7a] sm:$0xff] }
 0x10e   : > { %3253 = vmatprep.subr.bf16.mxu0 %v5267_v23  ;;  %3305 = vmatpush3.bf16.msra.mxu1 %v3302_v19  ;;  %v900_v19 = vld [vmem:[#allocation2 + $0x52] sm:$0xff] }
 0x10f   : > { %2198 = vmatmul.mubr.f32.gmra.mrb[74].mxu1 %v4265_v61  ;;  %3307 = vmatprep.subr.bf16.mxu1 %v3306_v29  ;;  %v5296_v61 = vld [vmem:[#allocation25_spill] sm:$0xff] }
 0x110   : > { %1933 = vmatmul.mubr.f32.gmra.mrb[10].mxu0 %v4157_v6  ;;  %2202 = vmatprep.mubr.f32.mxu1 %v4308_v11  ;;  %v5269_v6 = vld [vmem:[#allocation10_spill] sm:$0xff] }
 0x111   : > { %1937 = vmatprep.mubr.f32.mxu0 %v4178_v27  ;;  %3255 = vmatpush1.bf16.msra.mxu0 %v4149_v60  ;;  %v5268_v60 = vld [vmem:[#allocation13_spill] sm:$0xff]  ;;  %v5274_v27 = vld [vmem:[#allocation26_spill] sm:$0xff] }
 0x112   : > { %3256 = vmatprep.subr.bf16.mxu0 %v5267_v23  ;;  %3309 = vmatpush3.bf16.msra.mxu1 %v3306_v29 }
 0x113   : > { %2203 = vmatmul.mubr.f32.gmra.mrb[76].mxu1 %v4280_v35  ;;  %3311 = vmatprep.subr.bf16.mxu1 %v3310_v40  ;;  %v5297_v35 = vld [vmem:[#allocation27_spill] sm:$0xff] }
 0x114   : > { %1938 = vmatmul.mubr.f32.gmra.mrb[12].mxu0 %v4169_v15  ;;  %2207 = vmatprep.mubr.f32.mxu1 %v4318_v21  ;;  %v5272_v15 = vld [vmem:[#allocation15_spill] sm:$0xff] }
 0x115   : > { %1942 = vmatprep.mubr.f32.mxu0 %v4189_v36  ;;  %3258 = vmatpush1.bf16.msra.mxu0 %v4161_v9  ;;  %v5270_v9 = vld [vmem:[#allocation24_spill] sm:$0xff] }
 0x116   : > { %3259 = vmatprep.subr.bf16.mxu0 %v5267_v23  ;;  %3313 = vmatpush3.bf16.msra.mxu1 %v3310_v40  ;;  %v5277_v36 = vld [vmem:[#allocation12_spill] sm:$0xff] }
 0x117   : > { %2208 = vmatmul.mubr.f32.gmra.mrb[78].mxu1 %v4297_v59  ;;  %3315 = vmatprep.subr.bf16.mxu1 %v3314_v51  ;;  %v5305_v40 = vld [vmem:[#allocation44_spill] sm:$0xff] }
 0x118   : > { %1943 = vmatmul.mubr.f32.gmra.mrb[14].mxu0 %v4180_v28  ;;  %2212 = vmatprep.mubr.f32.mxu1 %v4328_v0  ;;  %v5275_v28 = vld [vmem:[#allocation33_spill] sm:$0xff] }
 0x119   : > { %1947 = vmatprep.mubr.f32.mxu0 %v4203_v49  ;;  %3261 = vmatpush1.bf16.msra.mxu0 %v4173_v20  ;;  %v5273_v20 = vld [vmem:[#allocation11_spill] sm:$0xff] }
 0x11a   : > { %3262 = vmatprep.subr.bf16.mxu0 %v5267_v23  ;;  %3317 = vmatpush3.bf16.msra.mxu1 %v3314_v51  ;;  %v5280_v49 = vld [vmem:[#allocation19_spill] sm:$0xff] }
 0x11b   : > { %2213 = vmatmul.mubr.f32.gmra.mrb[80].mxu1 %v4310_v12 }
 0x11c   : > { %1948 = vmatmul.mubr.f32.gmra.mrb[16].mxu0 %v4191_v38  ;;  %2217 = vmatprep.mubr.f32.mxu1 %v4338_v13  ;;  %v5278_v38 = vld [vmem:[#allocation28_spill] sm:$0xff] }
 0x11d   : > { %1952 = vmatprep.mubr.f32.mxu0 %v4217_v63  ;;  %3264 = vmatpush1.bf16.msra.mxu0 %v4184_v31  ;;  %v5276_v31 = vld [vmem:[#allocation17_spill] sm:$0xff]  ;;  %v5283_v63 = vld [vmem:[#allocation39_spill] sm:$0xff] }
 0x11e   : > { %3265 = vmatprep.subr.bf16.mxu0 %v5267_v23 }
 0x11f   : > { %2218 = vmatmul.mubr.f32.gmra.mrb[82].mxu1 %v4320_v24  ;;  %v5302_v24 = vld [vmem:[#allocation35_spill] sm:$0xff] }
 0x120   : > { %1953 = vmatmul.mubr.f32.gmra.mrb[18].mxu0 %v4205_v50  ;;  %2222 = vmatprep.mubr.f32.mxu1 %v4348_v32  ;;  %v5281_v50 = vld [vmem:[#allocation14_spill] sm:$0xff] }
 0x121   : > { %1957 = vmatprep.mubr.f32.mxu0 %v4231_v17  ;;  %3267 = vmatpush1.bf16.msra.mxu0 %v4197_v42  ;;  %v5279_v42 = vld [vmem:[#allocation36_spill] sm:$0xff]  ;;  %v5287_v17 = vld [vmem:[#allocation42_spill] sm:$0xff] }
 0x122   : > { %3268 = vmatprep.subr.bf16.mxu0 %v5267_v23 }
 0x123   : > { %2223 = vmatmul.mubr.f32.gmra.mrb[84].mxu1 %v4330_v44  ;;  %v4566_v44 = vld [vmem:[#allocation2 + $0x189] sm:$0xff] }
 0x124   : > { %1958 = vmatmul.mubr.f32.gmra.mrb[20].mxu0 %v4219_v2  ;;  %2227 = vmatprep.mubr.f32.mxu1 %v4358_v3  ;;  %v5284_v2 = vld [vmem:[#allocation20_spill] sm:$0xff] }
 0x125   : > { %1962 = vmatprep.mubr.f32.mxu0 %v5268_v60  ;;  %3270 = vmatpush1.bf16.msra.mxu0 %v5269_v6  ;;  %v904_v60 = vld [vmem:[#allocation2 + $0x82] sm:$0xff]  ;;  %v5306_v6 = vld [vmem:[#allocation46_spill] sm:$0xff] }
 0x126   : > { %3271 = vmatprep.subr.bf16.mxu0 %v5267_v23 }
 0x127   : > { %2228 = vmatmul.mubr.f32.gmra.mrb[86].mxu1 %v5270_v9  ;;  %v905_v9 = vld [vmem:[#allocation2 + $0x92] sm:$0xff] }
 0x128   : > { %1963 = vmatmul.mubr.f32.gmra.mrb[22].mxu0 %v4233_v18  ;;  %2232 = vmatprep.mubr.f32.mxu1 %v5271_v14  ;;  %v5288_v18 = vld [vmem:[#allocation21_spill] sm:$0xff] }
 0x129   : > { %1967 = vmatprep.mubr.f32.mxu0 %v5272_v15  ;;  %3273 = vmatpush1.bf16.msra.mxu0 %v5273_v20  ;;  %v906_v20 = vld [vmem:[#allocation2 + $0x9a] sm:$0xff] }
 0x12a   : > { %3274 = vmatprep.subr.bf16.mxu0 %v5267_v23 }
 0x12b   : > { %2233 = vmatmul.mubr.f32.gmra.mrb[88].mxu1 %v5274_v27  ;;  %v5307_v27 = vld [vmem:[#allocation48_spill] sm:$0xff] }
 0x12c   : > { %1968 = vmatmul.mubr.f32.gmra.mrb[24].mxu0 %v4248_v34  ;;  %2237 = vmatprep.mubr.f32.mxu1 %v5275_v28  ;;  %v5291_v34 = vld [vmem:[#allocation45_spill] sm:$0xff] }
 0x12d   : > { %1972 = vmatprep.mubr.f32.mxu0 %v5276_v31  ;;  %3276 = vmatpush1.bf16.msra.mxu0 %v5277_v36 }
 0x12e   : > { %3277 = vmatprep.subr.bf16.mxu0 %v5267_v23 }
 0x12f   : > { %2238 = vmatmul.mubr.f32.gmra.mrb[90].mxu1 %v5278_v38  ;;  %v908_v38 = vld [vmem:[#allocation2 + $0xb2] sm:$0xff] }
 0x130   : > { %1973 = vmatmul.mubr.f32.gmra.mrb[26].mxu0 %v4263_v58  ;;  %2242 = vmatprep.mubr.f32.mxu1 %v5279_v42  ;;  %v5295_v58 = vld [vmem:[#allocation43_spill] sm:$0xff] }
 0x131   : > { %1977 = vmatprep.mubr.f32.mxu0 %v5280_v49  ;;  %3279 = vmatpush1.bf16.msra.mxu0 %v5281_v50  ;;  %v909_v49 = vld [vmem:[#allocation2 + $0xc2] sm:$0xff] }
 0x132   : > { %3280 = vmatprep.subr.bf16.mxu0 %v5267_v23 }
 0x133   : > { %2243 = vmatmul.mubr.f32.gmra.mrb[92].mxu1 %v5282_v53  ;;  %v4607_v53 = vld [vmem:[#allocation2 + $0x182] sm:$0xff] }
 0x134   : > { %1978 = vmatmul.mubr.f32.gmra.mrb[28].mxu0 %v4278_v30  ;;  %2247 = vmatprep.mubr.f32.mxu1 %v5283_v63  ;;  %v4560_v30 = vld [vmem:[#allocation2 + $0x181] sm:$0xff] }
 0x135   : > { %1982 = vmatprep.mubr.f32.mxu0 %v5284_v2  ;;  %3282 = vmatpush1.bf16.msra.mxu0 %v5285_v7  ;;  %v910_v2 = vld [vmem:[#allocation2 + $0xca] sm:$0xff]  ;;  %v911_v7 = vld [vmem:[#allocation2 + $0xda] sm:$0xff] }
 0x136   : > { %3283 = vmatprep.subr.bf16.mxu0 %v5267_v23  ;;  %v5294_v23 = vld [vmem:[#allocation23_spill] sm:$0xff] }
 0x137   : > { %2248 = vmatmul.mubr.f32.gmra.mrb[94].mxu1 %v5286_v8 }
 0x138   : > { %1983 = vmatmul.mubr.f32.gmra.mrb[30].mxu0 %v4295_v52  ;;  %2252 = vmatprep.mubr.f32.mxu1 %v5287_v17 }
 0x139   : > { %1987 = vmatprep.mubr.f32.mxu0 %v5288_v18  ;;  %3285 = vmatpush1.bf16.msra.mxu0 %v5289_v22  ;;  %v912_v18 = vld [vmem:[#allocation2 + $0xe2] sm:$0xff]  ;;  %v913_v22 = vld [vmem:[#allocation2 + $0xf2] sm:$0xff] }
 0x13b   : > { %2253 = vmatmul.mubr.f32.gmra.mrb[96].mxu1 %v5290_v33 }
 0x13c   : > { %1988 = vmatmul.mubr.f32.gmra.mrb[32].mxu0 %v4308_v11  ;;  %2257 = vmatprep.mubr.f32.mxu1 %v5291_v34  ;;  %v864_v11 = vld [vmem:[#allocation2 + $0x1a1] sm:$0xff] }
 0x13d   : > { %1992 = vmatprep.mubr.f32.mxu0 %v5292_v39  ;;  %v769_v39 = vld [vmem:[#allocation2 + $0x30] sm:$0xff] }
 0x13f   : > { %2258 = vmatmul.mubr.f32.gmra.mrb[98].mxu1 %v5293_v43 }
 0x140   : > { %1993 = vmatmul.mubr.f32.gmra.mrb[34].mxu0 %v4318_v21  ;;  %2262 = vmatprep.mubr.f32.mxu1 %v4428_v1 }
 0x141   : > { %1997 = vmatprep.mubr.f32.mxu0 %v5294_v23  ;;  %v834_v23 = vld [vmem:[#allocation2 + $0x39] sm:$0xff] }
 0x143   : > { %2263 = vmatmul.mubr.f32.gmra.mrb[100].mxu1 %v5295_v58 }
 0x144   : > { %1998 = vmatmul.mubr.f32.gmra.mrb[36].mxu0 %v4328_v0  ;;  %2267 = vmatprep.mubr.f32.mxu1 %v4438_v55  ;;  %v5299_v0 = vld [vmem:[#allocation29_spill] sm:$0xff] }
 0x145   : > { %2002 = vmatprep.mubr.f32.mxu0 %v5296_v61 }
 0x147   : > { %2268 = vmatmul.mubr.f32.gmra.mrb[102].mxu1 %v4420_v54  ;;  %v5300_v54 = vld [vmem:[#allocation49_spill] sm:$0xff] }
 0x148   : > { %2003 = vmatmul.mubr.f32.gmra.mrb[38].mxu0 %v4338_v13  ;;  %2272 = vmatprep.mubr.f32.mxu1 %v4560_v30  ;;  %v3686_v13 = vld [vmem:[#allocation2] sm:$0xff] }
 0x149   : > { %2007 = vmatprep.mubr.f32.mxu0 %v5297_v35 }
 0x14b   : > { %2273 = vmatmul.mubr.f32.gmra.mrb[104].mxu1 %v5298_v45 }
 0x14c   : > { %2008 = vmatmul.mubr.f32.gmra.mrb[40].mxu0 %v4348_v32  ;;  %2277 = vmatprep.mubr.f32.mxu1 %v4566_v44  ;;  %v897_v32 = vld [vmem:[#allocation2 + $0x32] sm:$0xff] }
 0x14d   : > { %2012 = vmatprep.mubr.f32.mxu0 %v5299_v0 }
 0x14e   : > { %v4572_v52 = vpop.f32.mrb[0].mxu1 }
 0x14f   : > { %2278 = vmatmul.mubr.f32.gmra.mrb[106].mxu1 %v5300_v54  ;;  %v1461_v59 = vpop.f32.mrb[1].mxu1  ;;  %v771_v54 = vld [vmem:[#allocation2 + $0x48] sm:$0xff] }
 0x150   : > { %2013 = vmatmul.mubr.f32.gmra.mrb[42].mxu0 %v4358_v3  ;;  %2282 = vmatprep.mubr.f32.mxu1 %v863_v46  ;;  %v898_v3 = vld [vmem:[#allocation2 + $0x3a] sm:$0xff]  ;;  %v835_v46 = vld [vmem:[#allocation2 + $0x49] sm:$0xff] }
 0x151   : > { %2017 = vmatprep.mubr.f32.mxu0 %v5301_v10 }
 0x152   : > { %v4577_v12 = vpop.f32.mrb[2].mxu1 }
 0x153   : > { %2283 = vmatmul.mubr.f32.gmra.mrb[108].mxu1 %v3686_v13  ;;  %v1466_v21 = vpop.f32.mrb[3].mxu1 }
 0x154   : > { %2018 = vmatmul.mubr.f32.gmra.mrb[44].mxu0 %v5271_v14  ;;  %2287 = vmatprep.mubr.f32.mxu1 %v864_v11 }
 0x155   : > { %2022 = vmatprep.mubr.f32.mxu0 %v5302_v24 }
 0x156   : > { %v4581_v25 = vpop.f32.mrb[4].mxu1 }
 0x157   : > { %2288 = vmatmul.mubr.f32.gmra.mrb[110].mxu1 %v3686_v13  ;;  %v1471_v16 = vpop.f32.mrb[5].mxu1 }
 0x158   : > { %2023 = vmatmul.mubr.f32.gmra.mrb[46].mxu0 %v5275_v28  ;;  %3046 = vmatprep.mubr.f32.mxu1 %v897_v32  ;;  %v907_v28 = vld [vmem:[#allocation2 + $0xaa] sm:$0xff] }
 0x159   : > { %2027 = vmatprep.mubr.f32.mxu0 %v5303_v41 }
 0x15a   : > { %v4585_v26 = vpop.f32.mrb[6].mxu1 }
 0x15b   : > { %3047 = vmatmul.mubr.f32.vlgmr.msra.gmra.mrb[112].mxu1 %v898_v3  ;;  %v1476_v37 = vpop.f32.mrb[7].mxu1  ;;  %v774_v3 = vld [vmem:[#allocation2 + $0x68] sm:$0xff] }
 0x15c   : > { %2028 = vmatmul.mubr.f32.gmra.mrb[48].mxu0 %v5279_v42  ;;  %3049 = vmatprep.mubr.f32.mxu1 %v899_v4  ;;  %v5308_v42 = vld [vmem:[#allocation50_spill] sm:$0xff]  ;;  %v839_v4 = vld [vmem:[#allocation2 + $0x79] sm:$0xff] }
 0x15d   : > { %2032 = vmatprep.mubr.f32.mxu0 %v5304_v62 }
 0x15e   : > { %v4589_v29 = vpop.f32.mrb[8].mxu1 }
 0x15f   : > { %3050 = vmatmul.mubr.f32.gmra.mrb[114].mxu1 %v900_v19  ;;  %v1481_v48 = vpop.f32.mrb[9].mxu1  ;;  %v775_v19 = vld [vmem:[#allocation2 + $0x78] sm:$0xff] }
 0x160   : > { %2033 = vmatmul.mubr.f32.gmra.mrb[50].mxu0 %v5283_v63  ;;  %3052 = vmatprep.mubr.f32.mxu1 %v901_v47  ;;  %v840_v48 = vld [vmem:[#allocation2 + $0x81] sm:$0xff] }
 0x161   : > { %2037 = vmatprep.mubr.f32.mxu0 %v5305_v40 }
 0x162   : > { %v4593_v5 = vpop.f32.mrb[10].mxu1 }
 0x163   : > { %3053 = vmatmul.mubr.f32.gmra.mrb[116].mxu1 %v902_v56  ;;  %v1486_v51 = vpop.f32.mrb[11].mxu1 }
 0x164   : > { %2038 = vmatmul.mubr.f32.gmra.mrb[52].mxu0 %v5287_v17  ;;  %3055 = vmatprep.mubr.f32.mxu1 %v903_v57  ;;  %v776_v57 = vld [vmem:[#allocation2 + $0x80] sm:$0xff] }
 0x165   : > { %2042 = vmatprep.mubr.f32.mxu0 %v5306_v6 }
 0x166   : > { %v4597_v14 = vpop.f32.mrb[12].mxu1 }
 0x167   : > { %3056 = vmatmul.mubr.f32.gmra.mrb[118].mxu1 %v904_v60  ;;  %v1491_v15 = vpop.f32.mrb[13].mxu1 }
 0x168   : > { %2043 = vmatmul.mubr.f32.gmra.mrb[54].mxu0 %v5291_v34  ;;  %3058 = vmatprep.mubr.f32.mxu1 %v905_v9 }
 0x169   : > { %2047 = vmatprep.mubr.f32.mxu0 %v5307_v27 }
 0x16a   : > { %v4601_v31 = vpop.f32.mrb[14].mxu1 }
 0x16b   : > { %3059 = vmatmul.mubr.f32.gmra.mrb[120].mxu1 %v906_v20  ;;  %v1496_v36 = vpop.f32.mrb[15].mxu1 }
 0x16c   : > { %2048 = vmatmul.mubr.f32.gmra.mrb[56].mxu0 %v4428_v1  ;;  %3061 = vmatprep.mubr.f32.mxu1 %v907_v28  ;;  %v4613_v1 = vld [vmem:[#allocation2 + $0x18a] sm:$0xff] }
 0x16d   : > { %2052 = vmatprep.mubr.f32.mxu0 %v5308_v42 }
 0x16e   : > { %v4605_v50 = vpop.f32.mrb[16].mxu1 }
 0x16f   : > { %3062 = vmatmul.mubr.f32.gmra.mrb[122].mxu1 %v908_v38  ;;  %v1501_v63 = vpop.f32.mrb[17].mxu1 }
 0x170   : > { %2053 = vmatmul.mubr.f32.gmra.mrb[58].mxu0 %v4438_v55  ;;  %3064 = vmatprep.mubr.f32.mxu1 %v909_v49  ;;  %v833_v55 = vld [vmem:[#allocation2 + $0x31] sm:$0xff] }
 0x171   : > { %2057 = vmatprep.mubr.f32.mxu0 %v4607_v53 }
 0x172   : > { %v4611_v8 = vpop.f32.mrb[18].mxu1 }
 0x173   : > { %3065 = vmatmul.mubr.f32.gmra.mrb[124].mxu1 %v910_v2  ;;  %v1506_v17 = vpop.f32.mrb[19].mxu1 }
 0x174   : > { %2058 = vmatmul.mubr.f32.gmra.mrb[60].mxu0 %v4560_v30  ;;  %3067 = vmatprep.mubr.f32.mxu1 %v911_v7  ;;  %v770_v30 = vld [vmem:[#allocation2 + $0x38] sm:$0xff] }
 0x175   : > { %2062 = vmatprep.mubr.f32.mxu0 %v4613_v1 }
 0x176   : > { %v4617_v33 = vpop.f32.mrb[20].mxu1 }
 0x177   : > { %3068 = vmatmul.mubr.f32.gmra.mrb[126].mxu1 %v912_v18  ;;  %v1511_v34 = vpop.f32.mrb[21].mxu1 }
 0x178   : > { %2063 = vmatmul.mubr.f32.gmra.mrb[62].mxu0 %v4566_v44  ;;  %3070 = vmatprep.mubr.f32.mxu1 %v913_v22 }
 0x179   : > { %2132 = vmatprep.mubr.f32.mxu0 %v833_v55 }
 0x17a   : > { %v4620_v43 = vpop.f32.mrb[22].mxu1 }
 0x17b   : > { %3071 = vmatmul.mubr.f32.gmra.mrb[128].mxu1 %v5296_v61  ;;  %v1516_v58 = vpop.f32.mrb[23].mxu1  ;;  %v836_v61 = vld [vmem:[#allocation2 + $0x51] sm:$0xff] }
 0x17c   : > { %2133 = vmatmul.mubr.f32.vlgmr.msra.gmra.mrb[0].mxu0 %v769_v39  ;;  %3073 = vmatprep.mubr.f32.mxu1 %v5297_v35  ;;  %v772_v35 = vld [vmem:[#allocation2 + $0x50] sm:$0xff] }
 0x17d   : > { %2137 = vmatprep.mubr.f32.mxu0 %v834_v23 }
 0x17e   : > { %v4624_v45 = vpop.f32.mrb[24].mxu1 }
 0x17f   : > { %3074 = vmatmul.mubr.f32.gmra.mrb[130].mxu1 %v5299_v0  ;;  %v1521_v44 = vpop.f32.mrb[25].mxu1  ;;  %v837_v0 = vld [vmem:[#allocation2 + $0x61] sm:$0xff] }
 0x180   : > { %2138 = vmatmul.mubr.f32.gmra.mrb[2].mxu0 %v770_v30  ;;  %3076 = vmatprep.mubr.f32.mxu1 %v5301_v10  ;;  %v773_v10 = vld [vmem:[#allocation2 + $0x60] sm:$0xff] }
 0x181   : > { %2142 = vmatprep.mubr.f32.mxu0 %v835_v46 }
 0x182   : > { %v4628_v59 = vpop.f32.mrb[26].mxu1 }
 0x183   : > { %3077 = vmatmul.mubr.f32.gmra.mrb[132].mxu1 %v5302_v24  ;;  %v1526_v11 = vpop.f32.mrb[27].mxu1  ;;  %v838_v24 = vld [vmem:[#allocation2 + $0x69] sm:$0xff] }
 0x184   : > { %2143 = vmatmul.mubr.f32.gmra.mrb[4].mxu0 %v771_v54  ;;  %3079 = vmatprep.mubr.f32.mxu1 %v5303_v41 }
 0x185   : > { %2147 = vmatprep.mubr.f32.mxu0 %v836_v61 }
 0x186   : > { %v4632_v13 = vpop.f32.mrb[28].mxu1 }
 0x187   : > { %3080 = vmatmul.mubr.f32.gmra.mrb[134].mxu1 %v5304_v62  ;;  %v1531_v21 = vpop.f32.mrb[29].mxu1  ;;  %v927_v62 = vld [vmem:[#allocation2 + $0x19a] sm:$0xff] }
 0x188   : > { %2148 = vmatmul.mubr.f32.gmra.mrb[6].mxu0 %v772_v35  ;;  %3082 = vmatprep.mubr.f32.mxu1 %v5305_v40  ;;  %v928_v40 = vld [vmem:[#allocation2 + $0x1a2] sm:$0xff] }
 0x189   : > { %2152 = vmatprep.mubr.f32.mxu0 %v837_v0 }
 0x18a   : > { %v4636_v32 = vpop.f32.mrb[30].mxu1 }
 0x18b   : > { %3083 = vmatmul.mubr.f32.gmra.mrb[136].mxu1 %v5306_v6  ;;  %v1536_v16 = vpop.f32.mrb[31].mxu1 }
 0x18c   : > { %2153 = vmatmul.mubr.f32.gmra.mrb[8].mxu0 %v773_v10  ;;  %3085 = vmatprep.mubr.f32.mxu1 %v5307_v27 }
 0x18d   : > { %2157 = vmatprep.mubr.f32.mxu0 %v838_v24 }
 0x18e   : > { %v4640_v41 = vpop.f32.mrb[32].mxu1 }
 0x18f   : > { %3086 = vmatmul.mubr.f32.gmra.mrb[138].mxu1 %v5308_v42  ;;  %v1541_v37 = vpop.f32.mrb[33].mxu1 }
 0x190   : > { %2158 = vmatmul.mubr.f32.gmra.mrb[10].mxu0 %v774_v3  ;;  %3088 = vmatprep.mubr.f32.mxu1 %v4607_v53 }
 0x191   : > { %2162 = vmatprep.mubr.f32.mxu0 %v839_v4 }
 0x192   : > { %v4644_v47 = vpop.f32.mrb[34].mxu1 }
 0x193   : > { %3089 = vmatmul.mubr.f32.gmra.mrb[140].mxu1 %v4613_v1  ;;  %v1546_v56 = vpop.f32.mrb[35].mxu1 }
 0x194   : > { %2163 = vmatmul.mubr.f32.gmra.mrb[12].mxu0 %v775_v19  ;;  %3091 = vmatprep.mubr.f32.mxu1 %v927_v62 }
 0x195   : > { %2167 = vmatprep.mubr.f32.mxu0 %v840_v48 }
 0x196   : > { %v4647_v51 = vpop.f32.mrb[36].mxu1 }
 0x197   : > { %3092 = vmatmul.mubr.f32.gmra.mrb[142].mxu1 %v928_v40  ;;  %v1551_v60 = vpop.f32.mrb[37].mxu1 }
 0x198   : > { %2168 = vmatmul.mubr.f32.gmra.mrb[14].mxu0 %v776_v57 }
 0x19a   : > { %v4649_v6 = vpop.f32.mrb[38].mxu1 }
 0x19b   : > { %v1556_v9 = vpop.f32.mrb[39].mxu1 }
 0x19e   : > { %v4651_v15 = vpop.f32.mrb[40].mxu1 }
 0x19f   : > { %v1561_v20 = vpop.f32.mrb[41].mxu1 }
 0x1a2   : > { %v4653_v27 = vpop.f32.mrb[42].mxu1 }
 0x1a3   : > { %v1566_v28 = vpop.f32.mrb[43].mxu1 }
 0x1a6   : > { %v4655_v36 = vpop.f32.mrb[44].mxu1 }
 0x1a7   : > { %v1571_v38 = vpop.f32.mrb[45].mxu1 }
 0x1aa   : > { %v4657_v42 = vpop.f32.mrb[46].mxu1 }
 0x1ab   : > { %v1576_v49 = vpop.f32.mrb[47].mxu1 }
 0x1ae   : > { %v4659_v53 = vpop.f32.mrb[48].mxu1 }
 0x1af   : > { %v1581_v63 = vpop.f32.mrb[49].mxu1 }
 0x1b2   : > { %v4661_v2 = vpop.f32.mrb[50].mxu1 }
 0x1b3   : > { %v1586_v7 = vpop.f32.mrb[51].mxu1 }
 0x1b6   : > { %v4663_v1 = vpop.f32.mrb[52].mxu1 }
 0x1b7   : > { %v1591_v17 = vpop.f32.mrb[53].mxu1 }
 0x1ba   : > { %v4665_v18 = vpop.f32.mrb[54].mxu1 }
 0x1bb   : > { %v1596_v22 = vpop.f32.mrb[55].mxu1 }
 0x1be   : > { %v4667_v55 = vpop.f32.mrb[56].mxu1 }
 0x1bf   : > { %v1601_v34 = vpop.f32.mrb[57].mxu1 }
 0x1c2   : > { %v4669_v39 = vpop.f32.mrb[58].mxu1 }
 0x1c3   : > { %v1606_v23 = vpop.f32.mrb[59].mxu1 }
 0x1c6   : > { %v4671_v58 = vpop.f32.mrb[60].mxu1 }
 0x1c7   : > { %v1611_v30 = vpop.f32.mrb[61].mxu1 }
 0x1ca   : > { %v4673_v46 = vpop.f32.mrb[62].mxu1 }
 0x1cb   : > { %v1616_v44 = vpop.f32.mrb[63].mxu1 }
 0x1ce   : > { %v2174_v54 = vpop.f32.mrb[64].mxu1 }
 0x1cf   : > { %v2176_v61 = vpop.f32.mrb[65].mxu1 }
 0x1d2   : > { %v2179_v11 = vpop.f32.mrb[66].mxu1 }
 0x1d3   : > { %v2181_v35 = vpop.f32.mrb[67].mxu1 }
 0x1d6   : > { %v2184_v0 = vpop.f32.mrb[68].mxu1 }
 0x1d7   : > { %v2186_v21 = vpop.f32.mrb[69].mxu1 }
 0x1da   : > { %v2189_v10 = vpop.f32.mrb[70].mxu1 }
 0x1db   : > { %v2191_v24 = vpop.f32.mrb[71].mxu1 }
 0x1de   : > { %v2194_v16 = vpop.f32.mrb[72].mxu1 }
 0x1df   : > { %v2196_v3 = vpop.f32.mrb[73].mxu1 }
 0x1e2   : > { %v2199_v4 = vpop.f32.mrb[74].mxu1 }
 0x1e3   : > { %v2201_v37 = vpop.f32.mrb[75].mxu1 }
 0x1e6   : > { %v2204_v19 = vpop.f32.mrb[76].mxu1 }
 0x1e7   : > { %v2206_v62 = vpop.f32.mrb[77].mxu1 }
 0x1ea   : > { %v2209_v48 = vpop.f32.mrb[78].mxu1 }
 0x1eb   : > { %v2211_v56 = vpop.f32.mrb[79].mxu1 }
 0x1ee   : > { %v2214_v40 = vpop.f32.mrb[80].mxu1 }
 0x1ef   : > { %v1949_v57 = vpop.f32.mrb[16].mxu0  ;;  %v2216_v60 = vpop.f32.mrb[81].mxu1 }
 0x1f0   : > { %v3358_v9 = vadd.f32 %v1949_v57, %v4605_v50  ;;  %v1951_v20 = vpop.f32.mrb[17].mxu0 }
 0x1f2   : > { %v2219_v28 = vpop.f32.mrb[82].mxu1  ;;  %v4676_v38 = vadd.f32 %v3358_v9, %v2174_v54 }
 0x1f3   : > { %v1954_v49 = vpop.f32.mrb[18].mxu0  ;;  %v2221_v63 = vpop.f32.mrb[83].mxu1 }
 0x1f4   : > { %v3360_v7 = vadd.f32 %v1954_v49, %v4611_v8  ;;  %v1956_v17 = vpop.f32.mrb[19].mxu0 }
 0x1f6   : > { %v2224_v22 = vpop.f32.mrb[84].mxu1  ;;  %v4679_v34 = vadd.f32 %v3360_v7, %v2179_v11 }
 0x1f7   : > { %v1959_v23 = vpop.f32.mrb[20].mxu0  ;;  %v2226_v30 = vpop.f32.mrb[85].mxu1 }
 0x1f8   : > { %v3362_v44 = vadd.f32 %v1959_v23, %v4617_v33  ;;  %v1961_v61 = vpop.f32.mrb[21].mxu0 }
 0x1fa   : > { %v2229_v35 = vpop.f32.mrb[86].mxu1  ;;  %v4682_v21 = vadd.f32 %v3362_v44, %v2184_v0 }
 0x1fb   : > { %v1964_v50 = vpop.f32.mrb[22].mxu0  ;;  %v2231_v24 = vpop.f32.mrb[87].mxu1 }
 0x1fc   : > { %v3364_v54 = vadd.f32 %v1964_v50, %v4620_v43  ;;  %v1966_v3 = vpop.f32.mrb[23].mxu0 }
 0x1fe   : > { %v2234_v37 = vpop.f32.mrb[88].mxu1  ;;  %v4685_v62 = vadd.f32 %v3364_v54, %v2189_v10 }
 0x1ff   : > { %v1969_v8 = vpop.f32.mrb[24].mxu0  ;;  %v2236_v56 = vpop.f32.mrb[89].mxu1 }
 0x200   : > { %v3366_v11 = vadd.f32 %v1969_v8, %v4624_v45  ;;  %v1971_v57 = vpop.f32.mrb[25].mxu0 }
 0x202   : > { %v2239_v60 = vpop.f32.mrb[90].mxu1  ;;  %v4688_v9 = vadd.f32 %v3366_v11, %v2194_v16 }
 0x203   : > { %v1974_v33 = vpop.f32.mrb[26].mxu0  ;;  %v2241_v20 = vpop.f32.mrb[91].mxu1 }
 0x204   : > { %v3368_v0 = vadd.f32 %v1974_v33, %v4628_v59  ;;  %v1976_v49 = vpop.f32.mrb[27].mxu0 }
 0x206   : > { %v2244_v63 = vpop.f32.mrb[92].mxu1  ;;  %v4691_v7 = vadd.f32 %v3368_v0, %v2199_v4 }
 0x207   : > { %v1979_v43 = vpop.f32.mrb[28].mxu0  ;;  %v2246_v17 = vpop.f32.mrb[93].mxu1 }
 0x208   : > { %v3370_v10 = vadd.f32 %v1979_v43, %v4632_v13  ;;  %v1981_v23 = vpop.f32.mrb[29].mxu0 }
 0x20a   : > { %v2249_v30 = vpop.f32.mrb[94].mxu1  ;;  %v4694_v44 = vadd.f32 %v3370_v10, %v2204_v19 }
 0x20b   : > { %v1984_v45 = vpop.f32.mrb[30].mxu0  ;;  %v2251_v61 = vpop.f32.mrb[95].mxu1 }
 0x20c   : > { %v3372_v16 = vadd.f32 %v1984_v45, %v4636_v32  ;;  %v1986_v50 = vpop.f32.mrb[31].mxu0 }
 0x20e   : > { %v2254_v24 = vpop.f32.mrb[96].mxu1  ;;  %v4697_v54 = vadd.f32 %v3372_v16, %v2209_v48 }
 0x20f   : > { %v1989_v59 = vpop.f32.mrb[32].mxu0  ;;  %v2256_v3 = vpop.f32.mrb[97].mxu1 }
 0x210   : > { %v3374_v4 = vadd.f32 %v1989_v59, %v4640_v41  ;;  %v1991_v8 = vpop.f32.mrb[33].mxu0 }
 0x212   : > { %v2259_v56 = vpop.f32.mrb[98].mxu1  ;;  %v4700_v11 = vadd.f32 %v3374_v4, %v2214_v40 }
 0x213   : > { %v1994_v13 = vpop.f32.mrb[34].mxu0  ;;  %v2261_v57 = vpop.f32.mrb[99].mxu1 }
 0x214   : > { %v3376_v19 = vadd.f32 %v1994_v13, %v4644_v47  ;;  %v1996_v33 = vpop.f32.mrb[35].mxu0 }
 0x216   : > { %v2264_v20 = vpop.f32.mrb[100].mxu1  ;;  %v4703_v0 = vadd.f32 %v3376_v19, %v2219_v28 }
 0x217   : > { %v1999_v32 = vpop.f32.mrb[36].mxu0  ;;  %v2266_v49 = vpop.f32.mrb[101].mxu1 }
 0x218   : > { %v3378_v48 = vadd.f32 %v1999_v32, %v4647_v51  ;;  %v2001_v43 = vpop.f32.mrb[37].mxu0 }
 0x21a   : > { %v2269_v17 = vpop.f32.mrb[102].mxu1  ;;  %v4706_v10 = vadd.f32 %v3378_v48, %v2224_v22 }
 0x21b   : > { %v2004_v41 = vpop.f32.mrb[38].mxu0  ;;  %v2271_v23 = vpop.f32.mrb[103].mxu1 }
 0x21c   : > { %v3380_v40 = vadd.f32 %v2004_v41, %v4649_v6  ;;  %v2006_v45 = vpop.f32.mrb[39].mxu0 }
 0x21e   : > { %v2274_v61 = vpop.f32.mrb[104].mxu1  ;;  %v4709_v16 = vadd.f32 %v3380_v40, %v2229_v35 }
 0x21f   : > { %v2009_v47 = vpop.f32.mrb[40].mxu0  ;;  %v2276_v50 = vpop.f32.mrb[105].mxu1 }
 0x220   : > { %v3382_v28 = vadd.f32 %v2009_v47, %v4651_v15  ;;  %v2011_v59 = vpop.f32.mrb[41].mxu0 }
 0x222   : > { %v4712_v3 = vpop.f32.mrb[106].mxu1  ;;  %v4714_v51 = vadd.f32 %v3382_v28, %v2234_v37 }
 0x223   : > { %v2014_v4 = vpop.f32.mrb[42].mxu0  ;;  %v2281_v22 = vpop.f32.mrb[107].mxu1 }
 0x224   : > { %v3384_v8 = vadd.f32 %v2014_v4, %v4653_v27  ;;  %v2016_v13 = vpop.f32.mrb[43].mxu0 }
 0x226   : > { %v4717_v57 = vpop.f32.mrb[108].mxu1  ;;  %v4719_v6 = vadd.f32 %v3384_v8, %v2239_v60 }
 0x227   : > { %v2019_v35 = vpop.f32.mrb[44].mxu0  ;;  %v2286_v19 = vpop.f32.mrb[109].mxu1 }
 0x228   : > { %v3386_v33 = vadd.f32 %v2019_v35, %v4655_v36  ;;  %v2021_v32 = vpop.f32.mrb[45].mxu0 }
 0x22a   : > { %v4722_v15 = vpop.f32.mrb[110].mxu1  ;;  %v4724_v49 = vadd.f32 %v3386_v33, %v2244_v63 }
 0x22b   : > { %v2024_v37 = vpop.f32.mrb[46].mxu0  ;;  %v2291_v48 = vpop.f32.mrb[111].mxu1 }
 0x22c   : > { %v3388_v43 = vadd.f32 %v2024_v37, %v4657_v42  ;;  %v2026_v41 = vpop.f32.mrb[47].mxu0 }
 0x22e   : > { %v4727_v27 = vpop.f32.mrb[112].mxu1  ;;  %v4729_v23 = vadd.f32 %v3388_v43, %v2249_v30 }
 0x22f   : > { %v2029_v60 = vpop.f32.mrb[48].mxu0  ;;  %v4731_v40 = vpop.f32.mrb[113].mxu1 }
 0x230   : > { %v3390_v45 = vadd.f32 %v2029_v60, %v4659_v53  ;;  %v2031_v36 = vpop.f32.mrb[49].mxu0  ;;  %v4767_v60 = vld [vmem:[%s5153_s3] ss:$0 sm:$0xff] }
 0x232   : > { %v4734_v47 = vpop.f32.mrb[114].mxu1  ;;  %v4736_v50 = vadd.f32 %v3390_v45, %v2254_v24 }
 0x233   : > { %v2034_v63 = vpop.f32.mrb[50].mxu0  ;;  %v4738_v28 = vpop.f32.mrb[115].mxu1 }
 0x234   : > { %v3392_v42 = vadd.f32 %v2034_v63, %v4661_v2  ;;  %v2036_v59 = vpop.f32.mrb[51].mxu0 }
 0x236   : > { %v4741_v4 = vpop.f32.mrb[116].mxu1  ;;  %v4743_v30 = vadd.f32 %v3392_v42, %v2259_v56  ;;  %v4758_v56 = vld [vmem:[%s5152_s2] ss:$0 sm:$0xff] }
 0x237   : > { %v2039_v22 = vpop.f32.mrb[52].mxu0  ;;  %v4745_v8 = vpop.f32.mrb[117].mxu1 }
 0x238   : > { %v3394_v53 = vadd.f32 %v2039_v22, %v4663_v1  ;;  %v2041_v13 = vpop.f32.mrb[53].mxu0 }
 0x23a   : > { %v4748_v35 = vpop.f32.mrb[118].mxu1  ;;  %v4750_v24 = vadd.f32 %v3394_v53, %v2264_v20 }
 0x23b   : > { %v2044_v19 = vpop.f32.mrb[54].mxu0  ;;  %v4752_v33 = vpop.f32.mrb[119].mxu1 }
 0x23c   : > { %v3396_v2 = vadd.f32 %v2044_v19, %v4665_v18  ;;  %v2046_v32 = vpop.f32.mrb[55].mxu0 }
 0x23e   : > { %v3060_v37 = vpop.f32.mrb[120].mxu1  ;;  %v4760_v48 = vadd.f32 %v3396_v2, %v2269_v17 }
 0x23f   : > { %v2049_v1 = vpop.f32.mrb[56].mxu0  ;;  %v2405_v43 = vadd.f32 %v4679_v34, %v3060_v37  ;;  %v2399_v41 = vpop.f32.mrb[121].mxu1 }
 0x240   : > { %v3398_v20 = vadd.f32 %v2049_v1, %v4667_v55  ;;  %v2051_v18 = vpop.f32.mrb[57].mxu0  ;;  %v2400_v45 = vadd.f32 %v4676_v38, %v2399_v41 }
 0x241   : > { %v2534_v36 = vmul.f32 %v4758_v56, %v2405_v43 }
 0x242   : > { %v2533_v63 = vmul.f32 %v4758_v56, %v2400_v45  ;;  %v3063_v17 = vpop.f32.mrb[122].mxu1  ;;  %v4772_v42 = vadd.f32 %v3398_v20, %v2274_v61 }
 0x243   : > { %v4775_v34 = vadd.f32 %v4767_v60, %v2534_v36  ;;  %v2054_v59 = vpop.f32.mrb[58].mxu0  ;;  %v2415_v55 = vadd.f32 %v4685_v62, %v3063_v17  ;;  %v2409_v22 = vpop.f32.mrb[123].mxu1 }
 0x244   : > { %v4779_v53 = vadd.f32 %v4767_v60, %v2533_v63  ;;  %v3400_v13 = vadd.f32 %v2054_v59, %v4669_v39  ;;  %v2056_v38 = vpop.f32.mrb[59].mxu0  ;;  %v2410_v19 = vadd.f32 %v4682_v21, %v2409_v22 }
 0x245   : > { %v2605_v2 = vsub.f32 0.0, %v4775_v34  ;;  %v2536_v61 = vmul.f32 %v4758_v56, %v2415_v55 }
 0x246   : > { %v2604_v32 = vsub.f32 0.0, %v4779_v53  ;;  %v2535_v37 = vmul.f32 %v4758_v56, %v2410_v19  ;;  %v3066_v1 = vpop.f32.mrb[124].mxu1  ;;  %v4788_v62 = vadd.f32 %v3400_v13, %v4712_v3 }
 0x247   : > { %v2646_v43 = vmul.f32 1.442695, %v2605_v2  ;;  %v4791_v41 = vadd.f32 %v4767_v60, %v2536_v61  ;;  %v2059_v39 = vpop.f32.mrb[60].mxu0  ;;  %v2425_v20 = vadd.f32 %v4691_v7, %v3066_v1  ;;  %v2419_v21 = vpop.f32.mrb[125].mxu1 }
 0x248   : > { %v2644_v18 = vmul.f32 1.442695, %v2604_v32  ;;  %v4795_v45 = vadd.f32 %v4767_v60, %v2535_v37  ;;  %v3402_v36 = vadd.f32 %v2059_v39, %v4671_v58  ;;  %v2061_v63 = vpop.f32.mrb[61].mxu0  ;;  %v2420_v17 = vadd.f32 %v4688_v9, %v2419_v21 }
 0x249   : > { %3558 = vpow2.f32 %v2646_v43  ;;  %v2607_v3 = vsub.f32 0.0, %v4791_v41  ;;  %v2538_v59 = vmul.f32 %v4758_v56, %v2425_v20 }
 0x24a   : > { %3560 = vpow2.f32 %v2644_v18  ;;  %v2606_v55 = vsub.f32 0.0, %v4795_v45  ;;  %v2537_v7 = vmul.f32 %v4758_v56, %v2420_v17  ;;  %v3069_v22 = vpop.f32.mrb[126].mxu1  ;;  %v4804_v13 = vadd.f32 %v3402_v36, %v4717_v57 }
 0x24b   : > { %v2650_v38 = vmul.f32 1.442695, %v2607_v3  ;;  %v4807_v58 = vadd.f32 %v4767_v60, %v2538_v59  ;;  %v2064_v19 = vpop.f32.mrb[62].mxu0  ;;  %v2435_v9 = vadd.f32 %v4697_v54, %v3069_v22  ;;  %v2429_v2 = vpop.f32.mrb[127].mxu1 }
 0x24c   : > { %v2648_v61 = vmul.f32 1.442695, %v2606_v55  ;;  %v4811_v32 = vadd.f32 %v4767_v60, %v2537_v7  ;;  %v3404_v37 = vadd.f32 %v2064_v19, %v4673_v46  ;;  %v2066_v1 = vpop.f32.mrb[63].mxu0  ;;  %v2430_v43 = vadd.f32 %v4694_v44, %v2429_v2 }
 0x24d   : > { %3562 = vpow2.f32 %v2650_v38  ;;  %v2609_v57 = vsub.f32 0.0, %v4807_v58  ;;  %v2540_v39 = vmul.f32 %v4758_v56, %v2435_v9 }
 0x24e   : > { %3564 = vpow2.f32 %v2648_v61  ;;  %v2608_v20 = vsub.f32 0.0, %v4811_v32  ;;  %v2539_v54 = vmul.f32 %v4758_v56, %v2430_v43  ;;  %v3072_v21 = vpop.f32.mrb[128].mxu1  ;;  %v4820_v18 = vadd.f32 %v3404_v37, %v4722_v15 }
 0x24f   : > { %v2654_v36 = vmul.f32 1.442695, %v2609_v57  ;;  %v4823_v46 = vadd.f32 %v4767_v60, %v2540_v39  ;;  %v2134_v63 = vpop.f32.mrb[0].mxu0  ;;  %v2445_v44 = vadd.f32 %v4703_v0, %v3072_v21  ;;  %v2439_v17 = vpop.f32.mrb[129].mxu1 }
 0x250   : > { %v2652_v3 = vmul.f32 1.442695, %v2608_v20  ;;  %v4827_v59 = vadd.f32 %v4767_v60, %v2539_v54  ;;  %v3350_v55 = vadd.f32 %v2134_v63, %v4572_v52  ;;  %v2136_v7 = vpop.f32.mrb[1].mxu0  ;;  %v2440_v22 = vadd.f32 %v4700_v11, %v2439_v17 }
 0x251   : > { %3566 = vpow2.f32 %v2654_v36  ;;  %v2611_v15 = vsub.f32 0.0, %v4823_v46  ;;  %v2542_v38 = vmul.f32 %v4758_v56, %v2445_v44 }
 0x252   : > { %3568 = vpow2.f32 %v2652_v3  ;;  %v2610_v19 = vsub.f32 0.0, %v4827_v59  ;;  %v2360_v0 = vadd.f32 %v3350_v55, %v4731_v40  ;;  %v2541_v9 = vmul.f32 %v4758_v56, %v2440_v22  ;;  %v3075_v2 = vpop.f32.mrb[130].mxu1 }
 0x253   : > { %v3559_v61 = vpop.eup %3558  ;;  %v2658_v37 = vmul.f32 1.442695, %v2611_v15  ;;  %v4837_v52 = vadd.f32 %v4767_v60, %v2542_v38  ;;  %v2139_v1 = vpop.f32.mrb[2].mxu0  ;;  %v2455_v11 = vadd.f32 %v4709_v16, %v3075_v2 }
 0x254   : > { %v2449_v43 = vpop.f32.mrb[131].mxu1  ;;  %v3561_v57 = vpop.eup %3560  ;;  %v2701_v39 = vadd.f32 1.0, %v3559_v61  ;;  %v2656_v20 = vmul.f32 1.442695, %v2610_v19  ;;  %v2525_v54 = vmul.f32 %v4758_v56, %v2360_v0  ;;  %v4842_v21 = vadd.f32 %v4767_v60, %v2541_v9 }
 0x255   : > { %v2141_v40 = vpop.f32.mrb[3].mxu0  ;;  %v2700_v36 = vadd.f32 1.0, %v3561_v57  ;;  %3570 = vpow2.f32 %v2658_v37  ;;  %v2613_v63 = vsub.f32 0.0, %v4837_v52  ;;  %v3351_v44 = vadd.f32 %v2139_v1, %v4577_v12 }
 0x256   : > { %3572 = vrcp.f32 %v2701_v39  ;;  %v4847_v17 = vadd.f32 %v4767_v60, %v2525_v54  ;;  %v2612_v16 = vsub.f32 0.0, %v4842_v21  ;;  %v2544_v3 = vmul.f32 %v4758_v56, %v2455_v11  ;;  %v3078_v55 = vpop.f32.mrb[132].mxu1 }
 0x257   : > { %v3563_v7 = vpop.eup %3562  ;;  %3574 = vrcp.f32 %v2700_v36  ;;  %v2662_v22 = vmul.f32 1.442695, %v2613_v63  ;;  %v2365_v15 = vadd.f32 %v3351_v44, %v4727_v27  ;;  %v2450_v38 = vadd.f32 %v4706_v10, %v2449_v43  ;;  %v2144_v19 = vpop.f32.mrb[4].mxu0 }
 0x258   : > { %v2459_v0 = vpop.f32.mrb[133].mxu1  ;;  %v3565_v12 = vpop.eup %3564  ;;  %v2703_v9 = vadd.f32 1.0, %v3563_v7  ;;  %3576 = vpow2.f32 %v2656_v20  ;;  %v2596_v2 = vsub.f32 0.0, %v4847_v17  ;;  %v2660_v61 = vmul.f32 1.442695, %v2612_v16 }
 0x259   : > { %v2146_v37 = vpop.f32.mrb[5].mxu0  ;;  %v2702_v1 = vadd.f32 1.0, %v3565_v12  ;;  %3578 = vpow2.f32 %v2662_v22  ;;  %v2526_v11 = vmul.f32 %v4758_v56, %v2365_v15  ;;  %v4856_v57 = vadd.f32 %v4767_v60, %v2544_v3 }
 0x25a   : > { %3580 = vrcp.f32 %v2703_v9  ;;  %v2628_v27 = vmul.f32 1.442695, %v2596_v2  ;;  %v2543_v10 = vmul.f32 %v4758_v56, %v2450_v38  ;;  %v3352_v43 = vadd.f32 %v2144_v19, %v4581_v25  ;;  %v3081_v39 = vpop.f32.mrb[134].mxu1 }
 0x25b   : > { %v3567_v20 = vpop.eup %3566  ;;  %3582 = vrcp.f32 %v2702_v1  ;;  %v4862_v54 = vadd.f32 %v4767_v60, %v2526_v11  ;;  %v2615_v40 = vsub.f32 0.0, %v4856_v57  ;;  %v2465_v36 = vadd.f32 %v4719_v6, %v3078_v55  ;;  %v2149_v63 = vpop.f32.mrb[6].mxu0 }
 0x25c   : > { %v4866_v44 = vpop.f32.mrb[135].mxu1  ;;  %v3569_v16 = vpop.eup %3568  ;;  %v2705_v3 = vadd.f32 1.0, %v3567_v20  ;;  %3584 = vpow2.f32 %v2628_v27  ;;  %v4869_v7 = vadd.f32 %v4767_v60, %v2543_v10  ;;  %v2370_v25 = vadd.f32 %v3352_v43, %v4738_v28 }
 0x25d   : > { %v2151_v22 = vpop.f32.mrb[7].mxu0  ;;  %v2704_v15 = vadd.f32 1.0, %v3569_v16  ;;  %3586 = vpow2.f32 %v2660_v61  ;;  %v2597_v38 = vsub.f32 0.0, %v4862_v54  ;;  %v2666_v6 = vmul.f32 1.442695, %v2615_v40 }
 0x25e   : > { %3588 = vrcp.f32 %v2705_v3  ;;  %v2614_v55 = vsub.f32 0.0, %v4869_v7  ;;  %v2527_v19 = vmul.f32 %v4758_v56, %v2370_v25  ;;  %v2546_v12 = vmul.f32 %v4758_v56, %v2465_v36  ;;  %v4880_v9 = vpop.f32.mrb[136].mxu1 }
 0x25f   : > { %v3571_v2 = vpop.eup %3570  ;;  %3590 = vrcp.f32 %v2704_v15  ;;  %v2630_v28 = vmul.f32 1.442695, %v2597_v38  ;;  %v2460_v37 = vadd.f32 %v4714_v51, %v2459_v0  ;;  %v3353_v1 = vadd.f32 %v2149_v63, %v4585_v26  ;;  %v4884_v61 = vpop.f32.mrb[8].mxu0 }
 0x260   : > { %v4886_v11 = vpop.f32.mrb[137].mxu1  ;;  %v3573_v27 = vpop.eup %3572  ;;  %v2707_v10 = vadd.f32 1.0, %v3571_v2  ;;  %3592 = vpow2.f32 %v2666_v6  ;;  %v2664_v43 = vmul.f32 1.442695, %v2614_v55  ;;  %v4889_v20 = vadd.f32 %v4767_v60, %v2527_v19 }
 0x261   : > { %v2156_v40 = vpop.f32.mrb[9].mxu0  ;;  %v3575_v36 = vpop.eup %3574  ;;  %v2765_v16 = vmul.f32 %v3573_v27, %v4775_v34  ;;  %3594 = vpow2.f32 %v2630_v28  ;;  %v4893_v51 = vadd.f32 %v4767_v60, %v2546_v12  ;;  %v2545_v26 = vmul.f32 %v4758_v56, %v2460_v37 }
 0x262   : > { %v3577_v0 = vpop.eup %3576  ;;  %v2764_v63 = vmul.f32 %v3575_v36, %v4779_v53  ;;  %3596 = vrcp.f32 %v2707_v10  ;;  %v2598_v3 = vsub.f32 0.0, %v4889_v20  ;;  %v2375_v25 = vadd.f32 %v3353_v1, %v4734_v47  ;;  %v4899_v22 = vpop.f32.mrb[138].mxu1 }
 0x263   : > { %v3579_v15 = vpop.eup %3578  ;;  %2797 = vst [vmem:[%s4902_s21 + $0x48] sm:$0xff] %v2765_v16  ;;  %v2706_v34 = vadd.f32 1.0, %v3577_v0  ;;  %3598 = vpow2.f32 %v2664_v43  ;;  %v2617_v38 = vsub.f32 0.0, %v4893_v51  ;;  %v4907_v6 = vadd.f32 %v4767_v60, %v2545_v26  ;;  %v4909_v53 = vpop.f32.mrb[10].mxu0 }
 0x264   : > { %v4911_v55 = vpop.f32.mrb[139].mxu1  ;;  %v3581_v47 = vpop.eup %3580  ;;  %2796 = vst [vmem:[%s4902_s21 + $0x40] sm:$0xff] %v2764_v63  ;;  %v2709_v19 = vadd.f32 1.0, %v3579_v15  ;;  %v2632_v12 = vmul.f32 1.442695, %v2598_v3  ;;  %v2528_v2 = vmul.f32 %v4758_v56, %v2375_v25  ;;  %v2475_v28 = vadd.f32 %v4729_v23, %v3081_v39 }
 0x265   : > { %v2161_v37 = vpop.f32.mrb[11].mxu0  ;;  %v3583_v1 = vpop.eup %3582  ;;  %v2767_v27 = vmul.f32 %v3581_v47, %v4791_v41  ;;  %3600 = vrcp.f32 %v2706_v34  ;;  %v2670_v10 = vmul.f32 1.442695, %v2617_v38  ;;  %v2616_v43 = vsub.f32 0.0, %v4907_v6 }
 0x266   : > { %v3585_v40 = vpop.eup %3584  ;;  %v2766_v36 = vmul.f32 %v3583_v1, %v4795_v45  ;;  %3602 = vrcp.f32 %v2709_v19  ;;  %v4920_v16 = vadd.f32 %v4767_v60, %v2528_v2  ;;  %v2548_v26 = vmul.f32 %v4758_v56, %v2475_v28  ;;  %v4923_v0 = vpop.f32.mrb[140].mxu1 }
 0x267   : > { %v3587_v23 = vpop.eup %3586  ;;  %2799 = vst [vmem:[%s4902_s21 + $0x58] sm:$0xff] %v2767_v27  ;;  %v2692_v39 = vadd.f32 1.0, %v3585_v40  ;;  %3604 = vpow2.f32 %v2632_v12  ;;  %v2668_v41 = vmul.f32 1.442695, %v2616_v43  ;;  %v2470_v63 = vadd.f32 %v4724_v49, %v4866_v44  ;;  %v4928_v3 = vpop.f32.mrb[12].mxu0 }
 0x268   : > { %v4930_v25 = vpop.f32.mrb[141].mxu1  ;;  %v3589_v45 = vpop.eup %3588  ;;  %2798 = vst [vmem:[%s4902_s21 + $0x50] sm:$0xff] %v2766_v36  ;;  %v2708_v15 = vadd.f32 1.0, %v3587_v23  ;;  %3606 = vpow2.f32 %v2670_v10  ;;  %v2599_v34 = vsub.f32 0.0, %v4920_v16  ;;  %v4935_v38 = vadd.f32 %v4767_v60, %v2548_v26 }
 0x269   : > { %v2166_v47 = vpop.f32.mrb[13].mxu0  ;;  %v3591_v19 = vpop.eup %3590  ;;  %v2769_v12 = vmul.f32 %v3589_v45, %v4807_v58  ;;  %3608 = vrcp.f32 %v2692_v39  ;;  %v2547_v49 = vmul.f32 %v4758_v56, %v2470_v63  ;;  %v3354_v44 = vadd.f32 %v4884_v61, %v4589_v29 }
 0x26a   : > { %v3593_v2 = vpop.eup %3592  ;;  %v2768_v28 = vmul.f32 %v3591_v19, %v4811_v32  ;;  %3610 = vrcp.f32 %v2708_v15  ;;  %v2634_v37 = vmul.f32 1.442695, %v2599_v34  ;;  %v2619_v1 = vsub.f32 0.0, %v4935_v38  ;;  %v4943_v27 = vpop.f32.mrb[142].mxu1 }
 0x26b   : > { %v3595_v10 = vpop.eup %3594  ;;  %2801 = vst [vmem:[%s4902_s21 + $0x68] sm:$0xff] %v2769_v12  ;;  %v2711_v43 = vadd.f32 1.0, %v3593_v2  ;;  %3612 = vpow2.f32 %v2668_v41  ;;  %v4947_v58 = vadd.f32 %v4767_v60, %v2547_v49  ;;  %v2380_v40 = vadd.f32 %v3354_v44, %v4745_v8  ;;  %v4950_v29 = vpop.f32.mrb[14].mxu0 }
 0x26c   : > { %v4952_v61 = vpop.f32.mrb[143].mxu1  ;;  %v3597_v32 = vpop.eup %3596  ;;  %2800 = vst [vmem:[%s4902_s21 + $0x60] sm:$0xff] %v2768_v28  ;;  %v2693_v36 = vadd.f32 1.0, %v3595_v10  ;;  %3614 = vpow2.f32 %v2634_v37  ;;  %v2674_v26 = vmul.f32 1.442695, %v2619_v1  ;;  %v2485_v23 = vadd.f32 %v4743_v30, %v4880_v9 }
 0x26d   : > { %v2171_v39 = vpop.f32.mrb[15].mxu0  ;;  %v3599_v41 = vpop.eup %3598  ;;  %v2771_v63 = vmul.f32 %v3597_v32, %v4823_v46  ;;  %3616 = vrcp.f32 %v2711_v43  ;;  %v2618_v8 = vsub.f32 0.0, %v4947_v58  ;;  %v2529_v45 = vmul.f32 %v4758_v56, %v2380_v40 }
 0x26e   : > { %3618 = vrcp.f32 %v2693_v36  ;;  %v2710_v15 = vadd.f32 1.0, %v3599_v41  ;;  %v2550_v34 = vmul.f32 %v4758_v56, %v2485_v23  ;;  %v2480_v47 = vadd.f32 %v4736_v50, %v4886_v11 }
 0x26f   : > { %v3601_v19 = vpop.eup %3600  ;;  %2803 = vst [vmem:[%s4902_s21 + $0x78] sm:$0xff] %v2771_v63  ;;  %3620 = vpow2.f32 %v2674_v26  ;;  %v2672_v30 = vmul.f32 1.442695, %v2618_v8  ;;  %v4965_v9 = vadd.f32 %v4767_v60, %v2529_v45  ;;  %v3355_v46 = vadd.f32 %v4909_v53, %v4593_v5 }
 0x270   : > { %v3603_v12 = vpop.eup %3602  ;;  %v2770_v49 = vmul.f32 %v3601_v19, %v4827_v59  ;;  %3622 = vrcp.f32 %v2710_v15  ;;  %v4971_v44 = vadd.f32 %v4767_v60, %v2550_v34  ;;  %v2549_v50 = vmul.f32 %v4758_v56, %v2480_v47 }
 0x271   : > { %v3605_v11 = vpop.eup %3604  ;;  %v2773_v2 = vmul.f32 %v3603_v12, %v4837_v52  ;;  %3624 = vpow2.f32 %v2672_v30  ;;  %v2600_v28 = vsub.f32 0.0, %v4965_v9  ;;  %v2385_v37 = vadd.f32 %v3355_v46, %v4741_v4 }
 0x272   : > { %v3607_v1 = vpop.eup %3606  ;;  %2802 = vst [vmem:[%s4902_s21 + $0x70] sm:$0xff] %v2770_v49  ;;  %v2694_v5 = vadd.f32 1.0, %v3605_v11  ;;  %v2621_v59 = vsub.f32 0.0, %v4971_v44  ;;  %v4980_v53 = vadd.f32 %v4767_v60, %v2549_v50  ;;  %v2495_v10 = vadd.f32 %v4760_v48, %v4899_v22 }
 0x273   : > { %v3609_v43 = vpop.eup %3608  ;;  %2805 = vst [vmem:[%s4902_s21 + $0x88] sm:$0xff] %v2773_v2  ;;  %v2713_v52 = vadd.f32 1.0, %v3607_v1  ;;  %v2636_v40 = vmul.f32 1.442695, %v2600_v28  ;;  %v2530_v32 = vmul.f32 %v4758_v56, %v2385_v37  ;;  %v2490_v4 = vadd.f32 %v4750_v24, %v4911_v55 }
 0x274   : > { %v3611_v36 = vpop.eup %3610  ;;  %v2756_v26 = vmul.f32 %v3609_v43, %v4847_v17  ;;  %3626 = vrcp.f32 %v2694_v5  ;;  %v2678_v23 = vmul.f32 1.442695, %v2621_v59  ;;  %v2620_v39 = vsub.f32 0.0, %v4980_v53 }
 0x275   : > { %v3613_v41 = vpop.eup %3612  ;;  %v2772_v48 = vmul.f32 %v3611_v36, %v4842_v21  ;;  %3628 = vrcp.f32 %v2713_v52  ;;  %v4992_v22 = vadd.f32 %v4767_v60, %v2530_v32  ;;  %v2552_v63 = vmul.f32 %v4758_v56, %v2495_v10 }
 0x276   : > { %v3615_v8 = vpop.eup %3614  ;;  %2788 = vst [vmem:[%s4902_s21] sm:$0xff] %v2756_v26  ;;  %v2712_v24 = vadd.f32 1.0, %v3613_v41  ;;  %3630 = vpow2.f32 %v2636_v40  ;;  %v2676_v55 = vmul.f32 1.442695, %v2620_v39  ;;  %v2551_v17 = vmul.f32 %v4758_v56, %v2490_v4 }
 0x277   : > { %v3617_v45 = vpop.eup %3616  ;;  %2804 = vst [vmem:[%s4902_s21 + $0x80] sm:$0xff] %v2772_v48  ;;  %v2695_v15 = vadd.f32 1.0, %v3615_v8  ;;  %3632 = vpow2.f32 %v2678_v23  ;;  %v2601_v21 = vsub.f32 0.0, %v4992_v22  ;;  %v5000_v34 = vadd.f32 %v4767_v60, %v2552_v63 }
 0x278   : > { %v3619_v47 = vpop.eup %3618  ;;  %v2775_v19 = vmul.f32 %v3617_v45, %v4856_v57  ;;  %3634 = vrcp.f32 %v2712_v24  ;;  %v5004_v30 = vadd.f32 %v4767_v60, %v2551_v17  ;;  %v3356_v46 = vadd.f32 %v4928_v3, %v4597_v14 }
 0x279   : > { %v3621_v12 = vpop.eup %3620  ;;  %v2757_v49 = vmul.f32 %v3619_v47, %v4862_v54  ;;  %3636 = vrcp.f32 %v2695_v15  ;;  %v2638_v50 = vmul.f32 1.442695, %v2601_v21  ;;  %v2623_v11 = vsub.f32 0.0, %v5000_v34 }
 0x27a   : > { %v3623_v2 = vpop.eup %3622  ;;  %2807 = vst [vmem:[%s4902_s21 + $0x98] sm:$0xff] %v2775_v19  ;;  %v2715_v28 = vadd.f32 1.0, %v3621_v12  ;;  %3638 = vpow2.f32 %v2676_v55  ;;  %v2622_v57 = vsub.f32 0.0, %v5004_v30  ;;  %v2390_v37 = vadd.f32 %v3356_v46, %v4752_v33 }
 0x27b   : > { %v3625_v1 = vpop.eup %3624  ;;  %2789 = vst [vmem:[%s4902_s21 + $0x8] sm:$0xff] %v2757_v49  ;;  %v2774_v14 = vmul.f32 %v3623_v2, %v4869_v7  ;;  %3640 = vpow2.f32 %v2638_v50  ;;  %v2682_v3 = vmul.f32 1.442695, %v2623_v11  ;;  %v2505_v54 = vadd.f32 %v4788_v62, %v4923_v0 }
 0x27c   : > { %3642 = vrcp.f32 %v2715_v28  ;;  %v2714_v5 = vadd.f32 1.0, %v3625_v1  ;;  %v2680_v59 = vmul.f32 1.442695, %v2622_v57  ;;  %v2531_v10 = vmul.f32 %v4758_v56, %v2390_v37 }
 0x27d   : > { %2806 = vst [vmem:[%s4902_s21 + $0x90] sm:$0xff] %v2774_v14  ;;  %3644 = vpow2.f32 %v2682_v3  ;;  %v2554_v43 = vmul.f32 %v4758_v56, %v2505_v54  ;;  %v2500_v33 = vadd.f32 %v4772_v42, %v4930_v25  ;;  %v3357_v7 = vadd.f32 %v4950_v29, %v4601_v31 }
 0x27e   : > { %v3627_v52 = vpop.eup %3626  ;;  %3646 = vrcp.f32 %v2714_v5  ;;  %v5025_v62 = vadd.f32 %v4767_v60, %v2531_v10  ;;  %v2515_v0 = vadd.f32 %v4820_v18, %v4943_v27  ;;  %v2510_v40 = vadd.f32 %v4804_v13, %v4952_v61 }
 0x27f   : > { %v3629_v32 = vpop.eup %3628  ;;  %v2758_v4 = vmul.f32 %v3627_v52, %v4889_v20  ;;  %3648 = vpow2.f32 %v2680_v59  ;;  %v5033_v42 = vadd.f32 %v4767_v60, %v2554_v43  ;;  %v2553_v31 = vmul.f32 %v4758_v56, %v2500_v33 }
 0x280   : > { %v3631_v25 = vpop.eup %3630  ;;  %v2777_v29 = vmul.f32 %v3629_v32, %v4893_v51  ;;  %v2602_v36 = vsub.f32 0.0, %v5025_v62  ;;  %v2395_v18 = vadd.f32 %v3357_v7, %v4748_v35  ;;  %v2556_v27 = vmul.f32 %v4758_v56, %v2515_v0 }
 0x281   : > { %v3633_v13 = vpop.eup %3632  ;;  %2790 = vst [vmem:[%s4902_s21 + $0x10] sm:$0xff] %v2758_v4  ;;  %v2696_v61 = vadd.f32 1.0, %v3631_v25  ;;  %v2625_v20 = vsub.f32 0.0, %v5033_v42  ;;  %v5043_v26 = vadd.f32 %v4767_v60, %v2553_v31  ;;  %v2555_v23 = vmul.f32 %v4758_v56, %v2510_v40 }
 0x282   : > { %v3635_v39 = vpop.eup %3634  ;;  %2809 = vst [vmem:[%s4902_s21 + $0xa8] sm:$0xff] %v2777_v29  ;;  %v2717_v51 = vadd.f32 1.0, %v3633_v13  ;;  %v2640_v41 = vmul.f32 1.442695, %v2602_v36  ;;  %v2532_v48 = vmul.f32 %v4758_v56, %v2395_v18  ;;  %v5049_v35 = vadd.f32 %v4767_v60, %v2556_v27 }
 0x283   : > { %v3637_v63 = vpop.eup %3636  ;;  %v2776_v8 = vmul.f32 %v3635_v39, %v4907_v6  ;;  %3650 = vrcp.f32 %v2696_v61  ;;  %v2686_v24 = vmul.f32 1.442695, %v2625_v20  ;;  %v2624_v55 = vsub.f32 0.0, %v5043_v26 }
 0x284   : > { %v3639_v17 = vpop.eup %3638  ;;  %v2759_v45 = vmul.f32 %v3637_v63, %v4920_v16  ;;  %3652 = vrcp.f32 %v2717_v51  ;;  %v5055_v15 = vadd.f32 %v4767_v60, %v2532_v48  ;;  %v2627_v56 = vsub.f32 0.0, %v5049_v35 }
 0x285   : > { %v3641_v21 = vpop.eup %3640  ;;  %2808 = vst [vmem:[%s4902_s21 + $0xa0] sm:$0xff] %v2776_v8  ;;  %v2716_v47 = vadd.f32 1.0, %v3639_v17  ;;  %3654 = vpow2.f32 %v2640_v41  ;;  %v2684_v19 = vmul.f32 1.442695, %v2624_v55  ;;  %v5060_v6 = vadd.f32 %v4767_v60, %v2555_v23 }
 0x286   : > { %v3643_v46 = vpop.eup %3642  ;;  %2791 = vst [vmem:[%s4902_s21 + $0x18] sm:$0xff] %v2759_v45  ;;  %v2697_v12 = vadd.f32 1.0, %v3641_v21  ;;  %3656 = vpow2.f32 %v2686_v24  ;;  %v2603_v16 = vsub.f32 0.0, %v5055_v15  ;;  %v2690_v1 = vmul.f32 1.442695, %v2627_v56 }
 0x287   : > { %v3645_v49 = vpop.eup %3644  ;;  %v2779_v50 = vmul.f32 %v3643_v46, %v4935_v38  ;;  %3658 = vrcp.f32 %v2716_v47  ;;  %v2626_v11 = vsub.f32 0.0, %v5060_v6 }
 0x288   : > { %v3647_v2 = vpop.eup %3646  ;;  %3660 = vrcp.f32 %v2697_v12  ;;  %v2719_v28 = vadd.f32 1.0, %v3645_v49  ;;  %v2642_v57 = vmul.f32 1.442695, %v2603_v16 }
 0x289   : > { %v3649_v37 = vpop.eup %3648  ;;  %2811 = vst [vmem:[%s4902_s21 + $0xb8] sm:$0xff] %v2779_v50  ;;  %v2778_v60 = vmul.f32 %v3647_v2, %v4947_v58  ;;  %3662 = vpow2.f32 %v2684_v19  ;;  %v2688_v3 = vmul.f32 1.442695, %v2626_v11 }
 0x28a   : > { %3664 = vrcp.f32 %v2719_v28  ;;  %v2718_v14 = vadd.f32 1.0, %v3649_v37 }
 0x28b   : > { %2810 = vst [vmem:[%s4902_s21 + $0xb0] sm:$0xff] %v2778_v60  ;;  %3666 = vpow2.f32 %v2642_v57 }
 0x28c   : > { %3668 = vrcp.f32 %v2718_v14 }
 0x28d   : > { %v3651_v38 = vpop.eup %3650  ;;  %3670 = vpow2.f32 %v2690_v1 }
 0x28e   : > { %v3653_v54 = vpop.eup %3652  ;;  %v2760_v5 = vmul.f32 %v3651_v38, %v4965_v9  ;;  %3672 = vpow2.f32 %v2688_v3 }
 0x28f   : > { %v3655_v59 = vpop.eup %3654  ;;  %v2781_v58 = vmul.f32 %v3653_v54, %v4971_v44 }
 0x290   : > { %v3657_v10 = vpop.eup %3656  ;;  %2792 = vst [vmem:[%s4902_s21 + $0x20] sm:$0xff] %v2760_v5  ;;  %v2698_v43 = vadd.f32 1.0, %v3655_v59 }
 0x291   : > { %v3659_v33 = vpop.eup %3658  ;;  %2813 = vst [vmem:[%s4902_s21 + $0xc8] sm:$0xff] %v2781_v58  ;;  %v2721_v7 = vadd.f32 1.0, %v3657_v10 }
 0x292   : > { %v3661_v52 = vpop.eup %3660  ;;  %v2780_v0 = vmul.f32 %v3659_v33, %v4980_v53  ;;  %3674 = vrcp.f32 %v2698_v43 }
 0x293   : > { %v3663_v40 = vpop.eup %3662  ;;  %v2761_v9 = vmul.f32 %v3661_v52, %v4992_v22  ;;  %3676 = vrcp.f32 %v2721_v7 }
 0x294   : > { %v3665_v32 = vpop.eup %3664  ;;  %2812 = vst [vmem:[%s4902_s21 + $0xc0] sm:$0xff] %v2780_v0  ;;  %v2720_v44 = vadd.f32 1.0, %v3663_v40 }
 0x295   : > { %v3667_v4 = vpop.eup %3666  ;;  %2793 = vst [vmem:[%s4902_s21 + $0x28] sm:$0xff] %v2761_v9  ;;  %v2783_v31 = vmul.f32 %v3665_v32, %v5000_v34 }
 0x296   : > { %v3669_v25 = vpop.eup %3668  ;;  %3678 = vrcp.f32 %v2720_v44  ;;  %v2699_v29 = vadd.f32 1.0, %v3667_v4 }
 0x297   : > { %v3671_v36 = vpop.eup %3670  ;;  %2815 = vst [vmem:[%s4902_s21 + $0xd8] sm:$0xff] %v2783_v31  ;;  %v2782_v53 = vmul.f32 %v3669_v25, %v5004_v30 }
 0x298   : > { %v3673_v18 = vpop.eup %3672  ;;  %3680 = vrcp.f32 %v2699_v29  ;;  %v2723_v22 = vadd.f32 1.0, %v3671_v36 }
 0x299   : > { %2814 = vst [vmem:[%s4902_s21 + $0xd0] sm:$0xff] %v2782_v53  ;;  %v2722_v27 = vadd.f32 1.0, %v3673_v18 }
 0x29a   : > { %3682 = vrcp.f32 %v2723_v22 }
 0x29b   : > { %3684 = vrcp.f32 %v2722_v27 }
 0x29c   : > { %v3675_v34 = vpop.eup %3674 }
 0x29d   : > { %v3677_v13 = vpop.eup %3676  ;;  %v2762_v61 = vmul.f32 %v3675_v34, %v5025_v62 }
 0x29e   : > { %v2785_v20 = vmul.f32 %v3677_v13, %v5033_v42 }
 0x29f   : > { %2794 = vst [vmem:[%s4902_s21 + $0x30] sm:$0xff] %v2762_v61 }
 0x2a0   : > { %v3679_v30 = vpop.eup %3678  ;;  %2817 = vst [vmem:[%s4902_s21 + $0xe8] sm:$0xff] %v2785_v20 }
 0x2a1   : > { %v2784_v23 = vmul.f32 %v3679_v30, %v5043_v26 }
 0x2a2   : > { %v3681_v39 = vpop.eup %3680 }
 0x2a3   : > { %2816 = vst [vmem:[%s4902_s21 + $0xe0] sm:$0xff] %v2784_v23  ;;  %v2763_v51 = vmul.f32 %v3681_v39, %v5055_v15 }
 0x2a4   : > { %v3683_v41 = vpop.eup %3682 }
 0x2a5   : > { %v3685_v48 = vpop.eup %3684  ;;  %2795 = vst [vmem:[%s4902_s21 + $0x38] sm:$0xff] %v2763_v51  ;;  %v2787_v62 = vmul.f32 %v3683_v41, %v5049_v35 }
 0x2a6   : > { %v2786_v42 = vmul.f32 %v3685_v48, %v5060_v6 }
 0x2a7   : > { %2819 = vst [vmem:[%s4902_s21 + $0xf8] sm:$0xff] %v2787_v62 }
 0x2a8   : > { %2818 = vst [vmem:[%s4902_s21 + $0xf0] sm:$0xff] %v2786_v42 }
 0x2a9   : > { %3728 = shalt.err (!%p3725_p6)
}
 0x2aa   : > { %s3729_s9 = scalar_lea.hbm %s5095_s29, 4096  ;;  %s3733_s12 = scalar_lea.hbm %s5154_s4, 8192 }
 0x2ab   : > { %p3730_p7 = scmp.ne.s32.totalorder %s5095_s29, %s3729_s9  ;;  %p3734_p0 = scmp.lt.u32.totalorder %s5095_s29, %s5154_s4 }
 0x2ac   : > { %p3735_p2 = scmp.lt.u32.totalorder %s3733_s12, %s3729_s9  ;;  %p3737_p8 = scmp.lt.u32.totalorder %s3729_s9, %s5095_s29 }
 0x2ad   : > { %p3731_p9 = pnand %p3730_p7, %p5309_p10 }
 0x2ae   : > { %p3736_p4 = por %p3735_p2, %p3734_p0 }
 0x2af   : > { %p3732_p12 = pneg %p3731_p9 }
 0x2b0   : > { %p3738_p11 = por %p3737_p8, %p3736_p4 }
 0x2b2   : > { %p3739_p13 = pnand %p3738_p11, %p3732_p12 }
 0x2b4   : > { %3742 = shalt.err (!%p3739_p13)
}
 0x2b5   : > { %s3805_s21 = smov 128   ;;  %s3806_s22 = smov 8  }
 0x2b6   : > { %3490 = dma.vmem_to_hbm [thread:$0]  (%p5309_p10), %s5097_s24, 4096, %s5095_s29, %s5104_s18, %s3805_s21, %s3805_s21, %s3806_s22  }
 0x2b7 PF: > { %p3502_p1 = scmp.ge.s32.totalorder %s3797_s20, 2  ;;  %s2850_s26 = sand.u32 1, %s3777_s15  }
 0x2b8   : > { %p5310_p3 = scmp.ne.s32.totalorder %s5220_s27, 0  ;;  %s2851_s5 = scalar_lea.sflag [#allocation6], %s2850_s26 }
 0x2ba   : > { %p3497_p5 = pnand %p3502_p1, %p5310_p3 }
 0x2bc   : > { %3772 = dma.done.wait (!%p3497_p5), %s2851_s5, 4096  }
 0x2bd   : > { %3774 = vsyncadd (!%p3497_p5), %s2851_s5, 4294963200  ;;  %s18_s20 = sadd.s32 1, %s3797_s20   ;;  %s5311_s15 = smov %s3781_s16 }
 0x2be   : > { %p15_p6 = scmp.ge.s32.totalorder %s18_s20, 4   ;;  %s5312_s16 = smov %s3785_s17 }
 0x2bf   : > { %s5313_s17 = smov %s3885_s28  ;;  %s5314_s18 = smov %s3793_s19 }
 0x2c0   : > { %s5315_s19 = smov %s5317_s23  ;;  %17 = sbr.rel (!%p15_p6) target bundleno = 5 (0x5), region = 89 }
 0x2c7   :  { %2856 = vsyncpa [#allocation5], 1 }
 0x2c8   :  { %2858 = vsyncpa [#allocation5 + $0x1], 1 }
 0x2c9   :  { %2859 = vsyncpa [#allocation6], 1 }
 0x2ca   :  { %2861 = vsyncpa [#allocation6 + $0x1], 1 }

</bundles_post_ra>
